<compile_context>
chip_gen: v5e
topology: v5e:2x2
jax: 0.10.0
libtpu: 0.0.40
codegen_flags: <defaults>
</compile_context>

<pallas_src>
import functools

import jax
import jax.numpy as jnp
from jax.experimental import pallas as pl
from jax.experimental.pallas import tpu as pltpu


# ----------------------------------------------------------------------------
# Small helpers
# ----------------------------------------------------------------------------
def _tensorcores_per_chip():
    # 2-way row splits only pay off on chips with 2 TensorCores (v7x/megacore);
    # on single-TC chips (v5e/v6e) an extra grid step is pure per-step overhead.
    try:
        kind = jax.devices()[0].device_kind.lower()
    except Exception:
        return 1
    return 2 if any(t in kind for t in ("v7", "v4", "v5p")) else 1


def _row_blocks(m):
    # Split rows across both TensorCores only when they exist and the split
    # stays sublane-aligned; otherwise a single block (working set is KB-scale,
    # far below any VMEM limit on every generation).
    if _tensorcores_per_chip() >= 2 and m % 16 == 0:
        return 2
    return 1


def _pack_width(raw):
    # Round a packed-output lane count up to a multiple of 128 (lane-dense
    # unmasked stores / single writeback stream).
    return max(128, ((raw + 127) // 128) * 128)


# ----------------------------------------------------------------------------
# Kernel 1: fused DPP SA layer
#   router (folded affine) + hard-gumbel gate + SA MLP chain (first matmul
#   split into xyz/feat parts) + upsample MLP chain + gated fusion.
#   Outputs: gate (N,1) and a lane-dense packed slab [fused | li | up | pad].
# ----------------------------------------------------------------------------
def _dpp_sa_kernel(*refs, npoint, n_sa, n_up, c_pad):
    n_wsa = 3 + 2 * (n_sa - 1)
    feat_ref, gum_ref, rel_ref, rw_ref, rb_ref = refs[:5]
    sa_refs = refs[5:5 + n_wsa]
    up_refs = refs[5 + n_wsa:5 + n_wsa + 2 * n_up]
    gate_ref, packed_ref = refs[5 + n_wsa + 2 * n_up:]

    feat = feat_ref[...]                                     # (N, Cin)

    # --- router: gate2(gate1(x)) folded into a single affine map -------------
    s = jnp.dot(feat, rw_ref[...], preferred_element_type=jnp.float32) + rb_ref[...]
    gum = gum_ref[...]
    gate = ((s + gum[:, 0:1]) >= (-s + gum[:, 1:2])).astype(jnp.float32)  # (N,1)
    gate_ref[...] = gate

    feat_s = feat[:npoint, :]                                # sampled rows (stub)

    # --- SA per-point MLP chain; first layer split (rel_xyz part + feat part)
    w0x, w0f, b0 = sa_refs[0], sa_refs[1], sa_refs[2]
    y = (jnp.dot(rel_ref[...], w0x[...], preferred_element_type=jnp.float32)
         + jnp.dot(feat_s, w0f[...], preferred_element_type=jnp.float32)
         + b0[...])
    y = jnp.maximum(y, 0.0)
    for l in range(1, n_sa):
        w, b = sa_refs[3 + 2 * (l - 1)], sa_refs[4 + 2 * (l - 1)]
        y = jnp.maximum(
            jnp.dot(y, w[...], preferred_element_type=jnp.float32) + b[...], 0.0)

    # --- upsample MLP chain on the sampled-point original features -----------
    u = feat_s
    for l in range(n_up):
        w, b = up_refs[2 * l], up_refs[2 * l + 1]
        u = jnp.maximum(
            jnp.dot(u, w[...], preferred_element_type=jnp.float32) + b[...], 0.0)

    # --- DPP gating fusion + lane-dense packed store --------------------------
    g_s = gate[:npoint, :]
    fused = y * g_s + u * (1.0 - g_s)
    parts = [fused, y, u]
    if c_pad > 0:
        parts.append(jnp.zeros((npoint, c_pad), jnp.float32))
    packed_ref[...] = jnp.concatenate(parts, axis=-1)


def dpp_sa_layer(feat, gumbel, rel_xyz, router_params, sa_layers, up_layers,
                 *, npoint, batch, n_in):
    """feat:(B*N,Cin), gumbel:(B*N,2), rel_xyz:(B*npoint,3).

    sa_layers / up_layers: list of (w:(Ci,Co), bias:(1,Co)) with BN folded in.
    Returns (gate (B*N,1), fused (B*np,Co), li (B*np,Co), up (B*np,Cup)).
    """
    c_in = feat.shape[1]
    c_out = sa_layers[-1][0].shape[1]
    c_up = up_layers[-1][0].shape[1]
    raw_w = 2 * c_out + c_up
    pack_w = _pack_width(raw_w)
    c_pad = pack_w - raw_w

    # Fold the router's two affine layers (no activation between them).
    rw1, rb1 = router_params['w1b1']
    rw2, rb2 = router_params['w2b2']
    rw = rw1 @ rw2                       # (Cin, 1)
    rb = rb1 @ rw2 + rb2                 # (1, 1)

    # Split the first SA weight into xyz / feature parts (kills host concat).
    w0, b0 = sa_layers[0]
    w0x, w0f = w0[:3], w0[3:]

    args = [feat, gumbel, rel_xyz, rw, rb, w0x, w0f, b0]
    in_specs = [
        pl.BlockSpec((n_in, c_in), lambda b: (b, 0)),
        pl.BlockSpec((n_in, 2), lambda b: (b, 0)),
        pl.BlockSpec((npoint, 3), lambda b: (b, 0)),
        pl.BlockSpec(rw.shape, lambda b: (0, 0)),
        pl.BlockSpec(rb.shape, lambda b: (0, 0)),
        pl.BlockSpec(w0x.shape, lambda b: (0, 0)),
        pl.BlockSpec(w0f.shape, lambda b: (0, 0)),
        pl.BlockSpec(b0.shape, lambda b: (0, 0)),
    ]
    for (w, b) in list(sa_layers[1:]) + list(up_layers):
        in_specs += [pl.BlockSpec(w.shape, lambda b: (0, 0)),
                     pl.BlockSpec(b.shape, lambda b: (0, 0))]
        args += [w, b]

    out_shape = (
        jax.ShapeDtypeStruct((batch * n_in, 1), jnp.float32),        # gate
        jax.ShapeDtypeStruct((batch * npoint, pack_w), jnp.float32), # packed slab
    )
    out_specs = [
        pl.BlockSpec((n_in, 1), lambda b: (b, 0)),
        pl.BlockSpec((npoint, pack_w), lambda b: (b, 0)),
    ]
    gate, packed = pl.pallas_call(
        functools.partial(_dpp_sa_kernel, npoint=npoint,
                          n_sa=len(sa_layers), n_up=len(up_layers), c_pad=c_pad),
        out_shape=out_shape,
        grid_spec=pltpu.PrefetchScalarGridSpec(
            num_scalar_prefetch=0,
            grid=(batch,),
            in_specs=in_specs,
            out_specs=out_specs),
        compiler_params=pltpu.CompilerParams(dimension_semantics=("parallel",)),
    )(*args)

    fused = packed[:, :c_out]
    li = packed[:, c_out:2 * c_out]
    up = packed[:, 2 * c_out:2 * c_out + c_up]
    return gate, fused, li, up


# ----------------------------------------------------------------------------
# Kernel 2: fused Vote_layer + following SA MLP chain
#   vote MLP -> ctr_reg -> clamp -> new xyz; rel_xyz = -clamped_offset feeds
#   the SA chain in-register.  One lane-dense packed output:
#   [vote_feat | sa_feat | ctr_offsets | new_xyz | pad]
# ----------------------------------------------------------------------------
def _vote_sa_kernel(*refs, n_vote, n_sa, c_pad):
    x_ref, xyz_ref = refs[0], refs[1]
    vrefs = refs[2:2 + 2 * n_vote]
    base = 2 + 2 * n_vote
    wr, br, lim = refs[base:base + 3]
    sa_refs = refs[base + 3:base + 3 + 3 + 2 * (n_sa - 1)]
    packed_ref = refs[-1]

    x = x_ref[...]

    # Vote MLP chain
    y = x
    for l in range(n_vote):
        w, b = vrefs[2 * l], vrefs[2 * l + 1]
        y = jnp.maximum(
            jnp.dot(y, w[...], preferred_element_type=jnp.float32) + b[...], 0.0)

    # ctr_reg + clamp + xyz shift
    off = jnp.dot(y, wr[...], preferred_element_type=jnp.float32) + br[...]
    lim_v = lim[...]
    off_c = jnp.clip(off, -lim_v, lim_v)
    nxyz = xyz_ref[...] + off_c

    # Following SA layer: new_xyz == vote centers  =>  rel_xyz = xyz - nxyz = -off_c
    w0x, w0f, b0 = sa_refs[0], sa_refs[1], sa_refs[2]
    z = (jnp.dot(-off_c, w0x[...], preferred_element_type=jnp.float32)
         + jnp.dot(x, w0f[...], preferred_element_type=jnp.float32)
         + b0[...])
    z = jnp.maximum(z, 0.0)
    for l in range(1, n_sa):
        w, b = sa_refs[3 + 2 * (l - 1)], sa_refs[4 + 2 * (l - 1)]
        z = jnp.maximum(
            jnp.dot(z, w[...], preferred_element_type=jnp.float32) + b[...], 0.0)

    rows = y.shape[0]
    parts = [y, z, off, nxyz]
    if c_pad > 0:
        parts.append(jnp.zeros((rows, c_pad), jnp.float32))
    packed_ref[...] = jnp.concatenate(parts, axis=-1)


def vote_sa2_layer(x, xyz, vote_params, sa2_layers, max_translate_range):
    """x:(M,Cin), xyz:(M,3) -> (vote_feat (M,Cv), sa_feat (M,Cs),
                                ctr_offsets (M,3), new_xyz (M,3))."""
    M, c_in = x.shape
    mlp = vote_params['mlp']
    wr, br = vote_params['ctr_reg']
    c_vote = mlp[-1][0].shape[1]
    c_off = wr.shape[1]
    c_sa = sa2_layers[-1][0].shape[1]
    raw_w = c_vote + c_sa + c_off + 3
    pack_w = _pack_width(raw_w)
    c_pad = pack_w - raw_w

    lim = jnp.asarray(max_translate_range, jnp.float32).reshape(1, c_off)
    s0, s0b = sa2_layers[0]
    s0x, s0f = s0[:3], s0[3:]

    nb = _row_blocks(M)
    tm = M // nb

    in_specs = [pl.BlockSpec((tm, c_in), lambda i: (i, 0)),
                pl.BlockSpec((tm, 3), lambda i: (i, 0))]
    args = [x, xyz]
    for (w, b) in mlp:
        in_specs += [pl.BlockSpec(w.shape, lambda i: (0, 0)),
                     pl.BlockSpec(b.shape, lambda i: (0, 0))]
        args += [w, b]
    in_specs += [pl.BlockSpec(wr.shape, lambda i: (0, 0)),
                 pl.BlockSpec(br.shape, lambda i: (0, 0)),
                 pl.BlockSpec(lim.shape, lambda i: (0, 0)),
                 pl.BlockSpec(s0x.shape, lambda i: (0, 0)),
                 pl.BlockSpec(s0f.shape, lambda i: (0, 0)),
                 pl.BlockSpec(s0b.shape, lambda i: (0, 0))]
    args += [wr, br, lim, s0x, s0f, s0b]
    for (w, b) in sa2_layers[1:]:
        in_specs += [pl.BlockSpec(w.shape, lambda i: (0, 0)),
                     pl.BlockSpec(b.shape, lambda i: (0, 0))]
        args += [w, b]

    packed = pl.pallas_call(
        functools.partial(_vote_sa_kernel, n_vote=len(mlp),
                          n_sa=len(sa2_layers), c_pad=c_pad),
        out_shape=jax.ShapeDtypeStruct((M, pack_w), jnp.float32),
        grid_spec=pltpu.PrefetchScalarGridSpec(
            num_scalar_prefetch=0,
            grid=(nb,),
            in_specs=in_specs,
            out_specs=pl.BlockSpec((tm, pack_w), lambda i: (i, 0))),
        compiler_params=pltpu.CompilerParams(dimension_semantics=("parallel",)),
    )(*args)

    vf = packed[:, :c_vote]
    sf = packed[:, c_vote:c_vote + c_sa]
    off = packed[:, c_vote + c_sa:c_vote + c_sa + c_off]
    nxyz = packed[:, c_vote + c_sa + c_off:c_vote + c_sa + c_off + 3]
    return vf, sf, off, nxyz


# ----------------------------------------------------------------------------
# Generic fused per-point MLP chain (fallback for non-DPP, non-fused SA layers;
# not exercised by the default config but kept for generality).
# ----------------------------------------------------------------------------
def _fused_mlp_kernel(*refs, n_layers):
    x_ref = refs[0]
    o_ref = refs[-1]
    y = x_ref[...]
    for l in range(n_layers):
        w, b = refs[1 + 2 * l], refs[2 + 2 * l]
        y = jnp.maximum(
            jnp.dot(y, w[...], preferred_element_type=jnp.float32) + b[...], 0.0)
    o_ref[...] = y.astype(o_ref.dtype)


def fused_mlp(x, layers):
    """x:(M,Cin); layers: list of (w:(Ci,Co), bias:(1,Co)) with BN folded."""
    M, c_in = x.shape
    c_out = layers[-1][0].shape[1]
    nb = _row_blocks(M)
    tm = M // nb

    in_specs = [pl.BlockSpec((tm, c_in), lambda i: (i, 0))]
    args = [x]
    for (w, b) in layers:
        in_specs += [pl.BlockSpec(w.shape, lambda i: (0, 0)),
                     pl.BlockSpec(b.shape, lambda i: (0, 0))]
        args += [w, b]

    return pl.pallas_call(
        functools.partial(_fused_mlp_kernel, n_layers=len(layers)),
        out_shape=jax.ShapeDtypeStruct((M, c_out), jnp.float32),
        grid_spec=pltpu.PrefetchScalarGridSpec(
            num_scalar_prefetch=0,
            grid=(nb,),
            in_specs=in_specs,
            out_specs=pl.BlockSpec((tm, c_out), lambda i: (i, 0))),
        compiler_params=pltpu.CompilerParams(dimension_semantics=("parallel",)),
    )(*args)


# ----------------------------------------------------------------------------
# Synthetic config + deterministic parameter init (BN-eval scale pre-folded)
# ----------------------------------------------------------------------------
LAYER_TYPES = ['SA_Layer', 'Vote_Layer', 'SA_Layer']
LAYER_INPUTS = [0, 1, 1]
CTR_IDX_LIST = [-1, -1, 2]
DPP_LAYERS = [0]
MAX_TRANSLATE_RANGE = [3.0, 3.0, 2.0]


def _uniform(key, shape, bound):
    return jax.random.uniform(key, shape, jnp.float32, -bound, bound)


def make_params(key):
    ks = iter(jax.random.split(key, 32))
    eps = 1e-5

    def conv_bn(cin, cout):
        # Conv2d(cin, cout, 1, bias=False) weight stored transposed (cin, cout);
        # BatchNorm eval mode (gamma=1, beta=0, mean=0, var=1): scale folded
        # directly into the weight; folded bias is zero.
        w = _uniform(next(ks), (cin, cout), 1.0 / (cin ** 0.5))
        scale = jnp.full((1, cout), (1.0 + eps) ** -0.5, jnp.float32)
        bias = jnp.zeros((1, cout), jnp.float32)
        return (w * scale, bias)

    def linear(cin, cout):
        bnd = 1.0 / (cin ** 0.5)
        return _uniform(next(ks), (cin, cout), bnd), _uniform(next(ks), (1, cout), bnd)

    return {
        # SA layer 0 (DPP layer): per-point MLP [3+4 -> 16 -> 32]
        'sa0': {'npoint': 128, 'mlp': [conv_bn(7, 16), conv_bn(16, 32)]},
        # DynamicPointPonderRouterMLP(feat_num=4): gate1(4->4), gate2(4->1)
        'router0': {'w1b1': linear(4, 4), 'w2b2': linear(4, 1)},
        # DynamicPointPonderConvUpSampling(mlps=[[16,32]], in=4, out=32): [4,16,32,32]
        'up0': [conv_bn(4, 16), conv_bn(16, 32), conv_bn(32, 32)],
        # Vote_layer: mlp [32 -> 64] + ctr_reg (64 -> 3, bias)
        'vote': {'mlp': [conv_bn(32, 64)], 'ctr_reg': linear(64, 3)},
        # SA layer 2 (centroid aggregation): [3+32 -> 64 -> 64]
        'sa2': {'npoint': 128, 'mlp': [conv_bn(35, 64), conv_bn(64, 64)]},
    }


# ----------------------------------------------------------------------------
# Backbone forward (mirrors IASSD_Backbone_DPP.forward)
# ----------------------------------------------------------------------------
def iassd_backbone_dpp_forward(batch_dict, params, gumbel_key):
    batch_size = batch_dict['batch_size']
    points = batch_dict['points']

    # break_up_pc
    batch_idx = points[:, 0]
    xyz = points[:, 1:4]
    features = points[:, 4:] if points.shape[-1] > 4 else None

    xyz = xyz.reshape(batch_size, -1, 3)
    n0 = xyz.shape[1]
    # canonical row-major (B, P, C) feature layout kept across the backbone;
    # (B, C, P) views are only materialized for the output dict at the end.
    feat_rows_list = [features.reshape(batch_size, n0, -1)]

    encoder_xyz = [xyz]
    sa_ins_preds = []
    encoder_coords = [jnp.concatenate(
        [batch_idx.reshape(batch_size, -1, 1), xyz], axis=-1)]

    current_routing_gate = jnp.ones(xyz.shape[0:2], jnp.float32)
    dpp_gates, dpp_inverted_gates = [], []
    dpp_upsampled_features, dpp_original_features = [], []

    correspondence_invert_gate = []
    correspondence_original_feat_upsample = []
    li_features_for_dpp = []
    centers = centers_origin = ctr_offsets = None
    prefused = {}      # layer idx -> (li_feat_rows, li_xyz) from fused Vote+SA

    module_params = [params['sa0'], params['vote'], params['sa2']]

    for i, layer_type in enumerate(LAYER_TYPES):
        xyz_input = encoder_xyz[LAYER_INPUTS[i]]
        feat_input = feat_rows_list[LAYER_INPUTS[i]]          # (B, P_in, C_in)
        B, P_in, C_in = feat_input.shape

        if layer_type == 'SA_Layer':
            if i in prefused:
                # This SA layer was computed inside the fused Vote+SA kernel.
                dpp_gates.append(current_routing_gate)
                li_feat_rows, li_xyz = prefused.pop(i)
                correspondence_invert_gate = []
                correspondence_original_feat_upsample = []
                li_features_for_dpp = []
            else:
                ctr_xyz = encoder_xyz[CTR_IDX_LIST[i]] if CTR_IDX_LIST[i] != -1 else None
                npoint = module_params[i]['npoint']
                # TODO(synk): pointnet2 CUDA farthest-point sampling + ball-query
                # grouping + max-pool are not reimplemented; the deterministic
                # stub samples the first `npoint` points with self-grouping.
                new_xyz = ctr_xyz if ctr_xyz is not None else xyz_input[:, :npoint, :]
                rel_xyz = (xyz_input[:, :npoint, :] - new_xyz).reshape(B * npoint, 3)

                if i in DPP_LAYERS:
                    gumbel = jax.random.gumbel(
                        jax.random.fold_in(gumbel_key, i), (B, P_in, 2), jnp.float32)
                    gate_full, fused, li_orig, upsampled = dpp_sa_layer(
                        feat_input.reshape(B * P_in, C_in),
                        gumbel.reshape(B * P_in, 2),
                        rel_xyz,
                        params['router0'], module_params[i]['mlp'], params['up0'],
                        npoint=npoint, batch=B, n_in=P_in)

                    current_routing_gate = gate_full.reshape(B, P_in)
                    assert current_routing_gate.shape[1] == xyz_input.shape[1]
                    dpp_gates.append(current_routing_gate)

                    corr_gate_rows = gate_full.reshape(B, P_in, 1)[:, :npoint, :]
                    correspondence_invert_gate = jnp.transpose(
                        1.0 - corr_gate_rows, (0, 2, 1))                       # (B,1,P)
                    correspondence_original_feat_upsample = jnp.transpose(
                        upsampled.reshape(B, npoint, -1), (0, 2, 1))           # (B,C,P)
                    li_features_for_dpp = jax.lax.stop_gradient(
                        jnp.transpose(li_orig.reshape(B, npoint, -1), (0, 2, 1)))
                    li_feat_rows = fused.reshape(B, npoint, -1)
                else:
                    dpp_gates.append(current_routing_gate)
                    feat_sampled = feat_input[:, :npoint, :]
                    h_sa = jnp.concatenate(
                        [rel_xyz.reshape(B, npoint, 3), feat_sampled],
                        axis=-1).reshape(B * npoint, 3 + C_in)
                    out = fused_mlp(h_sa, module_params[i]['mlp'])
                    li_feat_rows = out.reshape(B, npoint, -1)
                    correspondence_invert_gate = []
                    correspondence_original_feat_upsample = []
                    li_features_for_dpp = []
                li_xyz = new_xyz

        elif layer_type == 'Vote_Layer':
            nxt = i + 1
            fuse_next = (nxt < len(LAYER_TYPES)
                         and LAYER_TYPES[nxt] == 'SA_Layer'
                         and nxt not in DPP_LAYERS
                         and LAYER_INPUTS[nxt] == LAYER_INPUTS[i]
                         and CTR_IDX_LIST[nxt] == i + 1)
            # TODO(synk): standalone Vote-only kernel if the next layer is not
            # a fusable SA layer; this config always fuses.
            assert fuse_next
            vote_feat, sa_feat, offs, nxyz = vote_sa2_layer(
                feat_input.reshape(B * P_in, C_in),
                xyz_input.reshape(B * P_in, 3),
                module_params[i], module_params[nxt]['mlp'],
                MAX_TRANSLATE_RANGE)
            li_feat_rows = vote_feat.reshape(B, P_in, -1)
            li_xyz = nxyz.reshape(B, P_in, 3)
            ctr_offsets = offs.reshape(B, P_in, 3)
            centers = li_xyz
            centers_origin = xyz_input
            center_origin_batch_idx = batch_idx.reshape(
                batch_size, -1)[:, :centers_origin.shape[1]]
            encoder_coords.append(jnp.concatenate(
                [center_origin_batch_idx[..., None].astype(jnp.float32),
                 centers_origin.reshape(batch_size, -1, 3)], axis=-1))
            prefused[nxt] = (sa_feat.reshape(B, P_in, -1), li_xyz)

        encoder_xyz.append(li_xyz)
        li_batch_idx = batch_idx.reshape(batch_size, -1)[:, :li_xyz.shape[1]]
        encoder_coords.append(jnp.concatenate(
            [li_batch_idx[..., None].astype(jnp.float32),
             li_xyz.reshape(batch_size, -1, 3)], axis=-1))
        feat_rows_list.append(li_feat_rows)
        dpp_inverted_gates.append(correspondence_invert_gate)
        dpp_upsampled_features.append(correspondence_original_feat_upsample)
        dpp_original_features.append(li_features_for_dpp)
        sa_ins_preds.append([])   # no confidence MLP -> li_cls_pred is None

    ctr_batch_idx = batch_idx.reshape(batch_size, -1)[:, :li_xyz.shape[1]].reshape(-1)
    batch_dict['ctr_offsets'] = jnp.concatenate(
        [ctr_batch_idx[:, None], ctr_offsets.reshape(-1, 3)], axis=1)
    batch_dict['centers'] = jnp.concatenate(
        [ctr_batch_idx[:, None], centers.reshape(-1, 3)], axis=1)
    batch_dict['centers_origin'] = jnp.concatenate(
        [ctr_batch_idx[:, None], centers_origin.reshape(-1, 3)], axis=1)
    batch_dict['ctr_batch_idx'] = ctr_batch_idx
    # centers_features is exactly the canonical (rows, channels) layout.
    last = feat_rows_list[-1]
    batch_dict['centers_features'] = last.reshape(-1, last.shape[-1])
    # (B, C, P) views only at the output boundary (mirrors PyTorch layout).
    batch_dict['encoder_features'] = [
        jnp.transpose(f, (0, 2, 1)) for f in feat_rows_list]
    batch_dict['encoder_xyz'] = encoder_xyz
    batch_dict['encoder_coords'] = encoder_coords
    batch_dict['sa_ins_preds'] = sa_ins_preds
    batch_dict['dpp_gates'] = dpp_gates
    batch_dict['dpp_inverted_gates'] = dpp_inverted_gates
    batch_dict['dpp_upsampled_features'] = dpp_upsampled_features
    batch_dict['dpp_original_features'] = dpp_original_features
    return batch_dict


# ----------------------------------------------------------------------------
if __name__ == "__main__":
    key = jax.random.PRNGKey(0)
    k_xyz, k_feat, k_param, k_gumbel = jax.random.split(key, 4)

    B, N0, C0 = 2, 256, 4  # input_channels = 7 -> channel_in = 4
    xyz = jax.random.normal(k_xyz, (B, N0, 3), jnp.float32) * 10.0
    feats = jax.random.normal(k_feat, (B, N0, C0), jnp.float32)
    batch_idx = jnp.repeat(jnp.arange(B, dtype=jnp.float32), N0)
    points = jnp.concatenate(
        [batch_idx[:, None], xyz.reshape(-1, 3), feats.reshape(-1, C0)], axis=1)

    params = make_params(k_param)
    batch_dict = {'batch_size': B, 'points': points,
                  'frame_id': ['000000', '000001']}

    out = iassd_backbone_dpp_forward(batch_dict, params, k_gumbel)
    jax.block_until_ready((out['centers_features'], out['centers'],
                           out['ctr_offsets'], out['dpp_gates'][0]))

    assert out['centers_features'].shape == (B * 128, 64)
    assert out['centers'].shape == (B * 128, 4)
    assert out['ctr_offsets'].shape == (B * 128, 4)
    assert out['dpp_gates'][0].shape == (B, N0)
    assert out['dpp_upsampled_features'][0].shape == (B, 32, 128)
    assert out['encoder_features'][-1].shape == (B, 64, 128)
    assert not bool(jnp.isnan(out['centers_features']).any())
    assert not bool(jnp.isnan(out['centers']).any())
    print("KERNEL_OK")
</pallas_src>

<mosaic_0001>
module attributes {stable_mosaic.version = 11 : i64} {
  func.func @_dpp_sa_kernel(%arg0: i32, %arg1: memref<256x4xf32, #tpu.memory_space<vmem>>, %arg2: memref<256x2xf32, #tpu.memory_space<vmem>>, %arg3: memref<128x3xf32, #tpu.memory_space<vmem>>, %arg4: memref<4x1xf32, #tpu.memory_space<vmem>>, %arg5: memref<1x1xf32, #tpu.memory_space<vmem>>, %arg6: memref<3x16xf32, #tpu.memory_space<vmem>>, %arg7: memref<4x16xf32, #tpu.memory_space<vmem>>, %arg8: memref<1x16xf32, #tpu.memory_space<vmem>>, %arg9: memref<16x32xf32, #tpu.memory_space<vmem>>, %arg10: memref<1x32xf32, #tpu.memory_space<vmem>>, %arg11: memref<4x16xf32, #tpu.memory_space<vmem>>, %arg12: memref<1x16xf32, #tpu.memory_space<vmem>>, %arg13: memref<16x32xf32, #tpu.memory_space<vmem>>, %arg14: memref<1x32xf32, #tpu.memory_space<vmem>>, %arg15: memref<32x32xf32, #tpu.memory_space<vmem>>, %arg16: memref<1x32xf32, #tpu.memory_space<vmem>>, %arg17: memref<256x1xf32, #tpu.memory_space<vmem>>, %arg18: memref<128x128xf32, #tpu.memory_space<vmem>>) attributes {dimension_semantics = [#tpu.dimension_semantics<parallel>], iteration_bounds = array<i64: 2>, scalar_prefetch = 0 : i64, scratch_operands = 0 : i64, tpu.core_type = #tpu.core_type<tc>, window_params = [{transform_indices = @transform_0, window_bounds = array<i64: 256, 4>}, {transform_indices = @transform_1, window_bounds = array<i64: 256, 2>}, {transform_indices = @transform_2, window_bounds = array<i64: 128, 3>}, {pipeline_mode = #tpu.pipeline_mode<synchronous>, transform_indices = @transform_3, window_bounds = array<i64: 4, 1>}, {pipeline_mode = #tpu.pipeline_mode<synchronous>, transform_indices = @transform_4, window_bounds = array<i64: 1, 1>}, {pipeline_mode = #tpu.pipeline_mode<synchronous>, transform_indices = @transform_5, window_bounds = array<i64: 3, 16>}, {pipeline_mode = #tpu.pipeline_mode<synchronous>, transform_indices = @transform_6, window_bounds = array<i64: 4, 16>}, {pipeline_mode = #tpu.pipeline_mode<synchronous>, transform_indices = @transform_7, window_bounds = array<i64: 1, 16>}, {pipeline_mode = #tpu.pipeline_mode<synchronous>, transform_indices = @transform_8, window_bounds = array<i64: 16, 32>}, {pipeline_mode = #tpu.pipeline_mode<synchronous>, transform_indices = @transform_9, window_bounds = array<i64: 1, 32>}, {pipeline_mode = #tpu.pipeline_mode<synchronous>, transform_indices = @transform_10, window_bounds = array<i64: 4, 16>}, {pipeline_mode = #tpu.pipeline_mode<synchronous>, transform_indices = @transform_11, window_bounds = array<i64: 1, 16>}, {pipeline_mode = #tpu.pipeline_mode<synchronous>, transform_indices = @transform_12, window_bounds = array<i64: 16, 32>}, {pipeline_mode = #tpu.pipeline_mode<synchronous>, transform_indices = @transform_13, window_bounds = array<i64: 1, 32>}, {pipeline_mode = #tpu.pipeline_mode<synchronous>, transform_indices = @transform_14, window_bounds = array<i64: 32, 32>}, {pipeline_mode = #tpu.pipeline_mode<synchronous>, transform_indices = @transform_15, window_bounds = array<i64: 1, 32>}, {transform_indices = @transform_16, window_bounds = array<i64: 256, 1>}, {transform_indices = @transform_17, window_bounds = array<i64: 128, 128>}]} {
    %c0 = arith.constant 0 : index
    %c0_0 = arith.constant 0 : index
    %0 = vector.load %arg1[%c0, %c0_0] : memref<256x4xf32, #tpu.memory_space<vmem>>, vector<256x4xf32>
    %c0_1 = arith.constant 0 : index
    %c0_2 = arith.constant 0 : index
    %1 = vector.load %arg4[%c0_1, %c0_2] : memref<4x1xf32, #tpu.memory_space<vmem>>, vector<4x1xf32>
    %cst = arith.constant dense<0.000000e+00> : vector<256x1xf32>
    %2 = tpu.matmul %0, %1, %cst {dimension_numbers = #tpu.dot_dimension_numbers<[1], [0], [0], [1], [0, 0, 1, 1], [], []>} : vector<256x4xf32>, vector<4x1xf32>, vector<256x1xf32> -> vector<256x1xf32>
    %c0_3 = arith.constant 0 : index
    %c0_4 = arith.constant 0 : index
    %3 = vector.load %arg5[%c0_3, %c0_4] : memref<1x1xf32, #tpu.memory_space<vmem>>, vector<1x1xf32>
    %4 = vector.broadcast %3 : vector<1x1xf32> to vector<256x1xf32>
    %5 = arith.addf %2, %4 : vector<256x1xf32>
    %c0_5 = arith.constant 0 : index
    %c0_6 = arith.constant 0 : index
    %6 = vector.load %arg2[%c0_5, %c0_6] : memref<256x2xf32, #tpu.memory_space<vmem>>, vector<256x2xf32>
    %7 = vector.extract_strided_slice %6 {offsets = [0, 0], sizes = [256, 1], strides = [1, 1]} : vector<256x2xf32> to vector<256x1xf32>
    %8 = arith.addf %5, %7 : vector<256x1xf32>
    %cst_7 = arith.constant 0.000000e+00 : f32
    %9 = vector.broadcast %cst_7 : f32 to vector<256x1xf32>
    %10 = arith.subf %9, %5 : vector<256x1xf32>
    %11 = vector.extract_strided_slice %6 {offsets = [0, 1], sizes = [256, 1], strides = [1, 1]} : vector<256x2xf32> to vector<256x1xf32>
    %12 = arith.addf %10, %11 : vector<256x1xf32>
    %13 = arith.cmpf oge, %8, %12 : vector<256x1xf32>
    %14 = arith.extui %13 : vector<256x1xi1> to vector<256x1xi32>
    %15 = arith.sitofp %14 : vector<256x1xi32> to vector<256x1xf32>
    %c0_8 = arith.constant 0 : index
    %c0_9 = arith.constant 0 : index
    %16 = vector.load %arg17[%c0_8, %c0_9] : memref<256x1xf32, #tpu.memory_space<vmem>>, vector<256x1xf32>
    tpu.vector_store %arg17[%c0_8, %c0_9], %15 {strides = array<i32>} : memref<256x1xf32, #tpu.memory_space<vmem>>, vector<256x1xf32>,
    %17 = vector.extract_strided_slice %0 {offsets = [0, 0], sizes = [128, 4], strides = [1, 1]} : vector<256x4xf32> to vector<128x4xf32>
    %c0_10 = arith.constant 0 : index
    %c0_11 = arith.constant 0 : index
    %18 = vector.load %arg3[%c0_10, %c0_11] : memref<128x3xf32, #tpu.memory_space<vmem>>, vector<128x3xf32>
    %c0_12 = arith.constant 0 : index
    %c0_13 = arith.constant 0 : index
    %19 = vector.load %arg6[%c0_12, %c0_13] : memref<3x16xf32, #tpu.memory_space<vmem>>, vector<3x16xf32>
    %cst_14 = arith.constant dense<0.000000e+00> : vector<128x16xf32>
    %20 = tpu.matmul %18, %19, %cst_14 {dimension_numbers = #tpu.dot_dimension_numbers<[1], [0], [0], [1], [0, 0, 1, 1], [], []>} : vector<128x3xf32>, vector<3x16xf32>, vector<128x16xf32> -> vector<128x16xf32>
    %c0_15 = arith.constant 0 : index
    %c0_16 = arith.constant 0 : index
    %21 = vector.load %arg7[%c0_15, %c0_16] : memref<4x16xf32, #tpu.memory_space<vmem>>, vector<4x16xf32>
    %cst_17 = arith.constant dense<0.000000e+00> : vector<128x16xf32>
    %22 = tpu.matmul %17, %21, %cst_17 {dimension_numbers = #tpu.dot_dimension_numbers<[1], [0], [0], [1], [0, 0, 1, 1], [], []>} : vector<128x4xf32>, vector<4x16xf32>, vector<128x16xf32> -> vector<128x16xf32>
    %23 = arith.addf %20, %22 : vector<128x16xf32>
    %c0_18 = arith.constant 0 : index
    %c0_19 = arith.constant 0 : index
    %24 = vector.load %arg8[%c0_18, %c0_19] : memref<1x16xf32, #tpu.memory_space<vmem>>, vector<1x16xf32>
    %25 = vector.broadcast %24 : vector<1x16xf32> to vector<128x16xf32>
    %26 = arith.addf %23, %25 : vector<128x16xf32>
    %cst_20 = arith.constant 0.000000e+00 : f32
    %27 = vector.broadcast %cst_20 : f32 to vector<128x16xf32>
    %28 = arith.maximumf %26, %27 : vector<128x16xf32>
    %c0_21 = arith.constant 0 : index
    %c0_22 = arith.constant 0 : index
    %29 = vector.load %arg9[%c0_21, %c0_22] : memref<16x32xf32, #tpu.memory_space<vmem>>, vector<16x32xf32>
    %cst_23 = arith.constant dense<0.000000e+00> : vector<128x32xf32>
    %30 = tpu.matmul %28, %29, %cst_23 {dimension_numbers = #tpu.dot_dimension_numbers<[1], [0], [0], [1], [0, 0, 1, 1], [], []>} : vector<128x16xf32>, vector<16x32xf32>, vector<128x32xf32> -> vector<128x32xf32>
    %c0_24 = arith.constant 0 : index
    %c0_25 = arith.constant 0 : index
    %31 = vector.load %arg10[%c0_24, %c0_25] : memref<1x32xf32, #tpu.memory_space<vmem>>, vector<1x32xf32>
    %32 = vector.broadcast %31 : vector<1x32xf32> to vector<128x32xf32>
    %33 = arith.addf %30, %32 : vector<128x32xf32>
    %cst_26 = arith.constant 0.000000e+00 : f32
    %34 = vector.broadcast %cst_26 : f32 to vector<128x32xf32>
    %35 = arith.maximumf %33, %34 : vector<128x32xf32>
    %c0_27 = arith.constant 0 : index
    %c0_28 = arith.constant 0 : index
    %36 = vector.load %arg11[%c0_27, %c0_28] : memref<4x16xf32, #tpu.memory_space<vmem>>, vector<4x16xf32>
    %cst_29 = arith.constant dense<0.000000e+00> : vector<128x16xf32>
    %37 = tpu.matmul %17, %36, %cst_29 {dimension_numbers = #tpu.dot_dimension_numbers<[1], [0], [0], [1], [0, 0, 1, 1], [], []>} : vector<128x4xf32>, vector<4x16xf32>, vector<128x16xf32> -> vector<128x16xf32>
    %c0_30 = arith.constant 0 : index
    %c0_31 = arith.constant 0 : index
    %38 = vector.load %arg12[%c0_30, %c0_31] : memref<1x16xf32, #tpu.memory_space<vmem>>, vector<1x16xf32>
    %39 = vector.broadcast %38 : vector<1x16xf32> to vector<128x16xf32>
    %40 = arith.addf %37, %39 : vector<128x16xf32>
    %cst_32 = arith.constant 0.000000e+00 : f32
    %41 = vector.broadcast %cst_32 : f32 to vector<128x16xf32>
    %42 = arith.maximumf %40, %41 : vector<128x16xf32>
    %c0_33 = arith.constant 0 : index
    %c0_34 = arith.constant 0 : index
    %43 = vector.load %arg13[%c0_33, %c0_34] : memref<16x32xf32, #tpu.memory_space<vmem>>, vector<16x32xf32>
    %cst_35 = arith.constant dense<0.000000e+00> : vector<128x32xf32>
    %44 = tpu.matmul %42, %43, %cst_35 {dimension_numbers = #tpu.dot_dimension_numbers<[1], [0], [0], [1], [0, 0, 1, 1], [], []>} : vector<128x16xf32>, vector<16x32xf32>, vector<128x32xf32> -> vector<128x32xf32>
    %c0_36 = arith.constant 0 : index
    %c0_37 = arith.constant 0 : index
    %45 = vector.load %arg14[%c0_36, %c0_37] : memref<1x32xf32, #tpu.memory_space<vmem>>, vector<1x32xf32>
    %46 = vector.broadcast %45 : vector<1x32xf32> to vector<128x32xf32>
    %47 = arith.addf %44, %46 : vector<128x32xf32>
    %cst_38 = arith.constant 0.000000e+00 : f32
    %48 = vector.broadcast %cst_38 : f32 to vector<128x32xf32>
    %49 = arith.maximumf %47, %48 : vector<128x32xf32>
    %c0_39 = arith.constant 0 : index
    %c0_40 = arith.constant 0 : index
    %50 = vector.load %arg15[%c0_39, %c0_40] : memref<32x32xf32, #tpu.memory_space<vmem>>, vector<32x32xf32>
    %cst_41 = arith.constant dense<0.000000e+00> : vector<128x32xf32>
    %51 = tpu.matmul %49, %50, %cst_41 {dimension_numbers = #tpu.dot_dimension_numbers<[1], [0], [0], [1], [0, 0, 1, 1], [], []>} : vector<128x32xf32>, vector<32x32xf32>, vector<128x32xf32> -> vector<128x32xf32>
    %c0_42 = arith.constant 0 : index
    %c0_43 = arith.constant 0 : index
    %52 = vector.load %arg16[%c0_42, %c0_43] : memref<1x32xf32, #tpu.memory_space<vmem>>, vector<1x32xf32>
    %53 = vector.broadcast %52 : vector<1x32xf32> to vector<128x32xf32>
    %54 = arith.addf %51, %53 : vector<128x32xf32>
    %cst_44 = arith.constant 0.000000e+00 : f32
    %55 = vector.broadcast %cst_44 : f32 to vector<128x32xf32>
    %56 = arith.maximumf %54, %55 : vector<128x32xf32>
    %57 = vector.extract_strided_slice %15 {offsets = [0, 0], sizes = [128, 1], strides = [1, 1]} : vector<256x1xf32> to vector<128x1xf32>
    %58 = vector.broadcast %57 : vector<128x1xf32> to vector<128x32xf32>
    %59 = arith.mulf %35, %58 : vector<128x32xf32>
    %cst_45 = arith.constant 1.000000e+00 : f32
    %60 = vector.broadcast %cst_45 : f32 to vector<128x1xf32>
    %61 = arith.subf %60, %57 : vector<128x1xf32>
    %62 = vector.broadcast %61 : vector<128x1xf32> to vector<128x32xf32>
    %63 = arith.mulf %56, %62 : vector<128x32xf32>
    %64 = arith.addf %59, %63 : vector<128x32xf32>
    %cst_46 = arith.constant 0.000000e+00 : f32
    %65 = vector.broadcast %cst_46 : f32 to vector<128x32xf32>
    %66 = tpu.concatenate %64, %35, %56, %65 in 1 : vector<128x32xf32>, vector<128x32xf32>, vector<128x32xf32>, vector<128x32xf32> -> vector<128x128xf32>
    %c0_47 = arith.constant 0 : index
    %c0_48 = arith.constant 0 : index
    %67 = vector.load %arg18[%c0_47, %c0_48] : memref<128x128xf32, #tpu.memory_space<vmem>>, vector<128x128xf32>
    tpu.vector_store %arg18[%c0_47, %c0_48], %66 {strides = array<i32>} : memref<128x128xf32, #tpu.memory_space<vmem>>, vector<128x128xf32>,
    return
  }
  func.func @transform_0(%arg0: i32) -> (i32, i32) {
    %c0_i32 = arith.constant 0 : i32
    %c0_i32_0 = arith.constant 0 : i32
    return %arg0, %c0_i32 : i32, i32
  }
  func.func @transform_1(%arg0: i32) -> (i32, i32) {
    %c0_i32 = arith.constant 0 : i32
    %c0_i32_0 = arith.constant 0 : i32
    return %arg0, %c0_i32 : i32, i32
  }
  func.func @transform_2(%arg0: i32) -> (i32, i32) {
    %c0_i32 = arith.constant 0 : i32
    %c0_i32_0 = arith.constant 0 : i32
    return %arg0, %c0_i32 : i32, i32
  }
  func.func @transform_3(%arg0: i32) -> (i32, i32) {
    %c0_i32 = arith.constant 0 : i32
    %c0_i32_0 = arith.constant 0 : i32
    %c0_i32_1 = arith.constant 0 : i32
    return %c0_i32, %c0_i32_0 : i32, i32
  }
  func.func @transform_4(%arg0: i32) -> (i32, i32) {
    %c0_i32 = arith.constant 0 : i32
    %c0_i32_0 = arith.constant 0 : i32
    %c0_i32_1 = arith.constant 0 : i32
    return %c0_i32, %c0_i32_0 : i32, i32
  }
  func.func @transform_5(%arg0: i32) -> (i32, i32) {
    %c0_i32 = arith.constant 0 : i32
    %c0_i32_0 = arith.constant 0 : i32
    %c0_i32_1 = arith.constant 0 : i32
    return %c0_i32, %c0_i32_0 : i32, i32
  }
  func.func @transform_6(%arg0: i32) -> (i32, i32) {
    %c0_i32 = arith.constant 0 : i32
    %c0_i32_0 = arith.constant 0 : i32
    %c0_i32_1 = arith.constant 0 : i32
    return %c0_i32, %c0_i32_0 : i32, i32
  }
  func.func @transform_7(%arg0: i32) -> (i32, i32) {
    %c0_i32 = arith.constant 0 : i32
    %c0_i32_0 = arith.constant 0 : i32
    %c0_i32_1 = arith.constant 0 : i32
    return %c0_i32, %c0_i32_0 : i32, i32
  }
  func.func @transform_8(%arg0: i32) -> (i32, i32) {
    %c0_i32 = arith.constant 0 : i32
    %c0_i32_0 = arith.constant 0 : i32
    %c0_i32_1 = arith.constant 0 : i32
    return %c0_i32, %c0_i32_0 : i32, i32
  }
  func.func @transform_9(%arg0: i32) -> (i32, i32) {
    %c0_i32 = arith.constant 0 : i32
    %c0_i32_0 = arith.constant 0 : i32
    %c0_i32_1 = arith.constant 0 : i32
    return %c0_i32, %c0_i32_0 : i32, i32
  }
  func.func @transform_10(%arg0: i32) -> (i32, i32) {
    %c0_i32 = arith.constant 0 : i32
    %c0_i32_0 = arith.constant 0 : i32
    %c0_i32_1 = arith.constant 0 : i32
    return %c0_i32, %c0_i32_0 : i32, i32
  }
  func.func @transform_11(%arg0: i32) -> (i32, i32) {
    %c0_i32 = arith.constant 0 : i32
    %c0_i32_0 = arith.constant 0 : i32
    %c0_i32_1 = arith.constant 0 : i32
    return %c0_i32, %c0_i32_0 : i32, i32
  }
  func.func @transform_12(%arg0: i32) -> (i32, i32) {
    %c0_i32 = arith.constant 0 : i32
    %c0_i32_0 = arith.constant 0 : i32
    %c0_i32_1 = arith.constant 0 : i32
    return %c0_i32, %c0_i32_0 : i32, i32
  }
  func.func @transform_13(%arg0: i32) -> (i32, i32) {
    %c0_i32 = arith.constant 0 : i32
    %c0_i32_0 = arith.constant 0 : i32
    %c0_i32_1 = arith.constant 0 : i32
    return %c0_i32, %c0_i32_0 : i32, i32
  }
  func.func @transform_14(%arg0: i32) -> (i32, i32) {
    %c0_i32 = arith.constant 0 : i32
    %c0_i32_0 = arith.constant 0 : i32
    %c0_i32_1 = arith.constant 0 : i32
    return %c0_i32, %c0_i32_0 : i32, i32
  }
  func.func @transform_15(%arg0: i32) -> (i32, i32) {
    %c0_i32 = arith.constant 0 : i32
    %c0_i32_0 = arith.constant 0 : i32
    %c0_i32_1 = arith.constant 0 : i32
    return %c0_i32, %c0_i32_0 : i32, i32
  }
  func.func @transform_16(%arg0: i32) -> (i32, i32) {
    %c0_i32 = arith.constant 0 : i32
    %c0_i32_0 = arith.constant 0 : i32
    return %arg0, %c0_i32 : i32, i32
  }
  func.func @transform_17(%arg0: i32) -> (i32, i32) {
    %c0_i32 = arith.constant 0 : i32
    %c0_i32_0 = arith.constant 0 : i32
    return %arg0, %c0_i32 : i32, i32
  }
}

</mosaic_0001>

<bundles_post_ra>
// kernel: tpu_custom_call.1
= control target key start
LH: loop header
LB: loop body
LE: loop exit
PB: predicated region body
PF: predicated region fallthrough
CT: control target
= control target key end

     0   :  { %s4107_s0 = inlined_call_operand.vmem [shape: f32[512,4], index: 0, kind: input, shape index: {}]   ;;  %s4108_s1 = inlined_call_operand.vmem [shape: f32[512,2], index: 1, kind: input, shape index: {}]   ;;  %s4109_s2 = inlined_call_operand.vmem [shape: f32[256,3], index: 2, kind: input, shape index: {}]   ;;  %s4110_s3 = inlined_call_operand.vmem [shape: f32[4,1], index: 3, kind: input, shape index: {}]   ;;  %s4111_s4 = inlined_call_operand.<no memory space> [shape: f32[1,1], index: 4, kind: input, shape index: {}]   ;;  %s4112_s5 = inlined_call_operand.vmem [shape: f32[3,16], index: 5, kind: input, shape index: {}]   ;;  %s4113_s6 = inlined_call_operand.vmem [shape: f32[4,16], index: 6, kind: input, shape index: {}]   ;;  %s4114_s7 = inlined_call_operand.vmem [shape: f32[1,16], index: 7, kind: input, shape index: {}]   ;;  %s4115_s8 = inlined_call_operand.vmem [shape: f32[16,32], index: 8, kind: input, shape index: {}]   ;;  %s4116_s9 = inlined_call_operand.vmem [shape: f32[1,32], index: 9, kind: input, shape index: {}]   ;;  %s4117_s10 = inlined_call_operand.vmem [shape: f32[4,16], index: 10, kind: input, shape index: {}]   ;;  %s4118_s11 = inlined_call_operand.vmem [shape: f32[1,16], index: 11, kind: input, shape index: {}]   ;;  %s4119_s12 = inlined_call_operand.vmem [shape: f32[16,32], index: 12, kind: input, shape index: {}]   ;;  %s4120_s13 = inlined_call_operand.vmem [shape: f32[1,32], index: 13, kind: input, shape index: {}]   ;;  %s4121_s14 = inlined_call_operand.vmem [shape: f32[32,32], index: 14, kind: input, shape index: {}]   ;;  %s4122_s15 = inlined_call_operand.vmem [shape: f32[1,32], index: 15, kind: input, shape index: {}]   ;;  %s4123_s16 = inlined_call_operand.vmem [shape: f32[512,1], index: 16, kind: output, shape index: {0}]   ;;  %s4124_s17 = inlined_call_operand.hbm [shape: f32[256,128], index: 17, kind: output, shape index: {1}]  }
   0x1   :  { %4128 = sst [smem:[#allocation9_spill]] %s4107_s0  ;;  %v23_v0 = vstv %s4111_s4 }
   0x2   :  { %4129 = sst [smem:[#allocation10_spill]] %s4108_s1  ;;  %24 = vst [vmem:[#allocation2] sm:$0x1] %v23_v0 }
   0x3   :  { %4130 = sst [smem:[#allocation11_spill]] %s4110_s3 }
   0x4   :  { %4131 = sst [smem:[#allocation12_spill]] %s4112_s5 }
   0x5   :  { %4132 = sst [smem:[#allocation13_spill]] %s4113_s6 }
   0x6   :  { %4133 = sst [smem:[#allocation14_spill]] %s4117_s10 }
   0x7   :  { %25 = vsyncpa [#allocation4], 0 }
   0x8   :  { %27 = vsyncpa [#allocation4 + $0x1], 0  ;;  %s2997_s26 = smov 0   ;;  %s2999_s27 = smov 0  }
   0x9   :  { %s3001_s28 = smov 0   ;;  %s3003_s29 = smov 0  }
   0xa LB: > { %4134 = sst [smem:[#allocation6_spill]] %s2891_s28  ;;  %s3018_s4 = sadd.s32 4294967295, %s2895_s29   ;;  %s2895_s29 = sphi %s3003_s29, %s4145_s29   ;;  %s2891_s28 = sphi %s3001_s28, %s4147_s28   ;;  %s2887_s27 = sphi %s2999_s27, %s4149_s27   ;;  %s2883_s26 = sphi %s2997_s26, %s4148_s26  }
   0xb   : > { %s2538_s0 = sadd.s32 4294967294, %s2895_s29   ;;  %s3022_s30 = sadd.s32 1, %s2895_s29  }
   0xc   : > { %4135 = sst [smem:[#allocation7_spill]] %s3022_s30  ;;  %s417_s18 = sadd.s32 1, %s2891_s28 }
   0xd   : > { %s414_s19 = ssub.s32 %s2895_s29, %s3022_s30  ;;  %p427_p0 = scmp.ne.s32.totalorder %s2891_s28, %s2887_s27 }
   0xe   : > { %p415_p1 = scmp.eq.s32.totalorder %s414_s19, 0  ;;  %p428_p2 = scmp.eq.s32.totalorder %s3018_s4, 1 }
   0xf   : > { %p433_p3 = scmp.ne.s32.totalorder %s2887_s27, %s2883_s26  ;;  %p434_p4 = scmp.eq.s32.totalorder %s2538_s0, 1 }
  0x10   : > { %s3033_s1 = scalar_select %p415_p1, %s2891_s28, %s417_s18  }
  0x11   : > { %p3035_p5 = por %p428_p2, %p427_p0  ;;  %p3039_p6 = por %p434_p4, %p433_p3 }
  0x12   : > { %4136 = sst [smem:[#allocation8_spill]] %s3033_s1  ;;  %p2541_p7 = scmp.ge.s32.totalorder %s2895_s29, 1 }
  0x13   : > { %p518_p8 = scmp.lt.s32.totalorder %s2895_s29, 3 }
  0x15   : > { %p519_p9 = pnand %p2541_p7, %p518_p8 }
  0x16   : > { %s4139_s6 = sld [smem:[#allocation13_spill]] (!%p519_p9)  ;;  %s2543_s0 = sshll.u32 (!%p519_p9), %s3018_s4, 5 }
  0x17   : > { %522 = sbr.rel (%p519_p9) target bundleno = 808 (0x328), region = 84  ;;  %s4140_s5 = sld [smem:[#allocation12_spill]] (!%p519_p9) }
  0x18   : > { %s2547_s18 = sshll.u32 (!%p519_p9), %s3018_s4, 4  ;;  %s4141_s10 = sld [smem:[#allocation14_spill]] (!%p519_p9) }
  0x19   : > { %p586_p10 = scmp.lt.s32.totalorder (!%p519_p9), %s2543_s0, 63  ;;  %p598_p11 = scmp.lt.s32.totalorder (!%p519_p9), %s2547_s18, 31 }
  0x1a   : > { %s4142_s3 = sld [smem:[#allocation11_spill]] (!%p519_p9)  ;;  %s2720_s23 = sshll.u32 (!%p519_p9), %s3018_s4, 7 }
  0x1b   : > { %s4144_s28 = sld [smem:[#allocation10_spill]] (!%p519_p9) }
  0x1c   : > { %vm744_vm0 = vcmask 1043456   ;;  %v1263_v1 = vld [vmem:[%s4139_s6] sm:$0xf]  ;;  %vm1381_vm1 = vcmask 1042432   ;;  %s4151_s0 = smov (!%p586_p10, %s2543_s0), 63  ;;  %s4153_s18 = smov (!%p598_p11, %s2547_s18), 31 }
  0x1d   : > { %v1262_v2 = vld [vmem:[%s4140_s5] sm:$0x7]  ;;  %2616 = vmatpush.msk.msra.mxu1 %vm744_vm0, %v1263_v1  ;;  %s3059_s24 = sshll.u32 %s4151_s0, 3  ;;  %vm647_vm2 = vcmask 31744   ;;  %s4143_s6 = sld [smem:[#allocation9_spill]]  ;;  %vm1332_vm3 = vcmask 23552  }
  0x1e   : > { %2633 = vmatpush.msk.msra.mxu2 %vm1381_vm1, %v1262_v2  ;;  %v1622_v3 = vld [vmem:[%s4141_s10] sm:$0xf]  ;;  %s2548_s19 = sshll.u32 %s4153_s18, 3  ;;  %s2897_s5 = smov 127   ;;  %v1712_v48 = vld [vmem:[%s4119_s12 + $0x8] sm:$0xff]  ;;  %vm1213_vm4 = vcmask 7168  }
  0x1f   : > { %2666 = vmatpush.msk.msrb.mxu1 %vm744_vm0, %v1622_v3  ;;  %v1487_v54 = vld [vmem:[%s4115_s8 + $0x8] sm:$0xff]  ;;  %v1486_v55 = vld [vmem:[%s4115_s8] sm:$0xff]  ;;  %vm1492_vm6 = vcmask 130048   ;;  %s2900_s0 = smov 32  }
  0x20   : > { %v642_v4 = vld [vmem:[%s4142_s3] sm:$0xf]  ;;  %s3073_s3 = scalar_lea.vmem %s4109_s2, %s2548_s19  ;;  %1779 = vmatpush.msrb.mxu2 %v1712_v48  ;;  %1555 = vmatpush.msra.mxu3 %v1487_v54 }
  0x21   : > { %2551 = vmatpush.msk.msra.mxu0 %vm744_vm0, %v642_v4  ;;  %s3079_s30 = scalar_lea.vmem %s4144_s28, %s3059_s24  ;;  %v1246_v6 = vld [vmem:[%s3073_s3] sm:$0xff]  ;;  %v1247_v9 = vld [vmem:[%s3073_s3 + $0x8] sm:$0xff]  ;;  %v1248_v13 = vld [vmem:[%s3073_s3 + $0x10] sm:$0xff] }
  0x22   : > { %2634 = vmatmul.msk.f32.vlgmr.msra.gmra.mxu2 %vm1332_vm3, %v1246_v6  ;;  %v3088_v7 = vld [vmem:[%s3079_s30] sm:$0xff]  ;;  %v3102_v10 = vld [vmem:[%s3079_s30 + $0x10] sm:$0xff]  ;;  %v3105_v11 = vld [vmem:[%s3079_s30 + $0x8] sm:$0xff]  ;;  %1556 = vmatpush.msra.mxu3 %v1486_v55 }
  0x23   : > { %s3065_s1 = scalar_lea.vmem %s4143_s6, %s3059_s24  ;;  %989 = vrot.lane.b32.xlu0 %v3088_v7, %s2897_s5  ;;  %993 = vrot.lane.b32.xlu1 %v3102_v10, %s2897_s5  ;;  %v3121_v14 = vld [vmem:[%s3079_s30 + $0x18] sm:$0xff]  ;;  %v1250_v18 = vld [vmem:[%s3073_s3 + $0x20] sm:$0xff]  ;;  %s3352_s6 = scalar_lea.vmem %s4123_s16, %s3059_s24 }
  0x24   : > { %v3068_v5 = vld [vmem:[%s3065_s1] sm:$0xff]  ;;  %v3093_v8 = vld [vmem:[%s3065_s1 + $0x8] sm:$0xff]  ;;  %v3112_v12 = vld [vmem:[%s3065_s1 + $0x10] sm:$0xff] }
  0x25   : > { %2617 = vmatmul.msk.f32.vlgmr.msra.gmra.mxu1 %vm647_vm2, %v3068_v5  ;;  %2552 = vmatmul.msk.f32.vlgmr.msra.gmra.mxu0 %vm647_vm2, %v3068_v5  ;;  %v3126_v15 = vld [vmem:[%s3065_s1 + $0x18] sm:$0xff]  ;;  %v3135_v17 = vld [vmem:[%s3065_s1 + $0x20] sm:$0xff]  ;;  %v3144_v19 = vld [vmem:[%s3065_s1 + $0x28] sm:$0xff] }
  0x26   : > { %v1249_v16 = vld [vmem:[%s3073_s3 + $0x18] sm:$0xff]  ;;  %v1251_v20 = vld [vmem:[%s3073_s3 + $0x28] sm:$0xff]  ;;  %v3153_v21 = vld [vmem:[%s3065_s1 + $0x30] sm:$0xff] }
  0x27   : > { %v1252_v22 = vld [vmem:[%s3073_s3 + $0x30] sm:$0xff]  ;;  %v3162_v23 = vld [vmem:[%s3079_s30 + $0x20] sm:$0xff]  ;;  %v3167_v24 = vld [vmem:[%s3065_s1 + $0x38] sm:$0xff] }
  0x28   : > { %997 = vrot.lane.b32.xlu2 %v3162_v23, %s2897_s5  ;;  %v1253_v25 = vld [vmem:[%s3073_s3 + $0x38] sm:$0xff]  ;;  %v3176_v26 = vld [vmem:[%s3079_s30 + $0x28] sm:$0xff]  ;;  %v3179_v27 = vld [vmem:[%s3079_s30 + $0x30] sm:$0xff] }
  0x29   : > { %v3186_v28 = vld [vmem:[%s3065_s1 + $0x40] sm:$0xff]  ;;  %v3195_v30 = vld [vmem:[%s3079_s30 + $0x48] sm:$0xff]  ;;  %v3209_v33 = vld [vmem:[%s3079_s30 + $0x38] sm:$0xff] }
  0x2a   : > { %2635 = vmatmul.msk.f32.gmra.mxu2 %vm1332_vm3, %v1247_v9  ;;  %v1254_v29 = vld [vmem:[%s3073_s3 + $0x40] sm:$0xff]  ;;  %v3200_v31 = vld [vmem:[%s3065_s1 + $0x48] sm:$0xff]  ;;  %v3224_v36 = vld [vmem:[%s3065_s1 + $0x50] sm:$0xff] }
  0x2b   : > { %991 = vrot.lane.b32.xlu0 %v3105_v11, %s2897_s5  ;;  %995 = vrot.lane.b32.xlu1 %v3121_v14, %s2897_s5  ;;  %v1255_v32 = vld [vmem:[%s3073_s3 + $0x48] sm:$0xff]  ;;  %v3212_v34 = vld [vmem:[%s3079_s30 + $0x40] sm:$0xff] }
  0x2c   : > { %v3215_v35 = vld [vmem:[%s3079_s30 + $0x60] sm:$0xff]  ;;  %v1256_v37 = vld [vmem:[%s3073_s3 + $0x50] sm:$0xff]  ;;  %v3233_v38 = vld [vmem:[%s3079_s30 + $0x58] sm:$0xff] }
  0x2d   : > { %2618 = vmatmul.msk.f32.gmra.mxu1 %vm647_vm2, %v3093_v8  ;;  %2553 = vmatmul.msk.f32.gmra.mxu0 %vm647_vm2, %v3093_v8  ;;  %v3236_v39 = vld [vmem:[%s3079_s30 + $0x50] sm:$0xff]  ;;  %v3239_v40 = vld [vmem:[%s3079_s30 + $0x78] sm:$0xff]  ;;  %v3260_v44 = vld [vmem:[%s3079_s30 + $0x68] sm:$0xff] }
  0x2e   : > { %v3248_v41 = vld [vmem:[%s3065_s1 + $0x58] sm:$0xff]  ;;  %v3257_v43 = vld [vmem:[%s3079_s30 + $0x70] sm:$0xff]  ;;  %v3269_v46 = vld [vmem:[%s3065_s1 + $0x60] sm:$0xff] }
  0x2f   : > { %v1257_v42 = vld [vmem:[%s3073_s3 + $0x58] sm:$0xff]  ;;  %v879_v45 = vld [vmem:[%s3079_s30 + $0x90] sm:$0xff]  ;;  %v1258_v47 = vld [vmem:[%s3073_s3 + $0x60] sm:$0xff] }
  0x30   : > { %999 = vrot.lane.b32.xlu2 %v3176_v26, %s2897_s5  ;;  %v3281_v49 = vld [vmem:[%s3065_s1 + $0x68] sm:$0xff]  ;;  %v877_v51 = vld [vmem:[%s3079_s30 + $0x80] sm:$0xff]  ;;  %v3302_v56 = vld [vmem:[%s3065_s1 + $0x70] sm:$0xff] }
  0x31   : > { %v878_v50 = vld [vmem:[%s3079_s30 + $0x88] sm:$0xff]  ;;  %v881_v57 = vld [vmem:[%s3079_s30 + $0xa0] sm:$0xff]  ;;  %v880_v58 = vld [vmem:[%s3079_s30 + $0x98] sm:$0xff] }
  0x32   : > { %2636 = vmatmul.msk.f32.gmra.mxu2 %vm1332_vm3, %v1248_v13  ;;  %v1259_v52 = vld [vmem:[%s3073_s3 + $0x68] sm:$0xff]  ;;  %v885_v59 = vld [vmem:[%s3079_s30 + $0xc0] sm:$0xff]  ;;  %v1260_v60 = vld [vmem:[%s3073_s3 + $0x70] sm:$0xff] }
  0x33   : > { %1001 = vrot.lane.b32.xlu0 %v3179_v27, %s2897_s5  ;;  %1003 = vrot.lane.b32.xlu1 %v3209_v33, %s2897_s5  ;;  %v882_v53 = vld [vmem:[%s3079_s30 + $0xa8] sm:$0xff]  ;;  %v3317_v61 = vld [vmem:[%s3065_s1 + $0x78] sm:$0xff]  ;;  %v3331_v2 = vld [vmem:[#allocation2] ss:$0 sm:$0xff] }
  0x34   : > { %v884_v62 = vld [vmem:[%s3079_s30 + $0xb8] sm:$0xff]  ;;  %v883_v63 = vld [vmem:[%s3079_s30 + $0xb0] sm:$0xff]  ;;  %v886_v13 = vld [vmem:[%s3079_s30 + $0xc8] sm:$0xff] }
  0x35   : > { %2619 = vmatmul.msk.f32.gmra.mxu1 %vm647_vm2, %v3112_v12  ;;  %2554 = vmatmul.msk.f32.gmra.mxu0 %vm647_vm2, %v3112_v12  ;;  %v888_v0 = vld [vmem:[%s3079_s30 + $0xd8] sm:$0xff]  ;;  %v887_v9 = vld [vmem:[%s3079_s30 + $0xd0] sm:$0xff]  ;;  %v890_v48 = vld [vmem:[%s3079_s30 + $0xe8] sm:$0xff] }
  0x36   : > { %v1261_v1 = vld [vmem:[%s3073_s3 + $0x78] sm:$0xff]  ;;  %s2901_s3 = smov 64  }
  0x38   : > { %1005 = vrot.lane.b32.xlu2 %v3212_v34, %s2897_s5 }
  0x3a   : > { %2637 = vmatmul.msk.f32.gmra.mxu2 %vm1332_vm3, %v1249_v16  ;;  %v891_v16 = vld [vmem:[%s3079_s30 + $0xf0] sm:$0xff] }
  0x3b   : > { %1007 = vrot.lane.b32.xlu0 %v3195_v30, %s2897_s5  ;;  %1009 = vrot.lane.b32.xlu1 %v3236_v39, %s2897_s5 }
  0x3d   : > { %2620 = vmatmul.msk.f32.gmra.mxu1 %vm647_vm2, %v3126_v15  ;;  %2555 = vmatmul.msk.f32.gmra.mxu0 %vm647_vm2, %v3126_v15 }
  0x40   : > { %1011 = vrot.lane.b32.xlu2 %v3233_v38, %s2897_s5 }
  0x42   : > { %2638 = vmatmul.msk.f32.gmra.mxu2 %vm1332_vm3, %v1250_v18 }
  0x43   : > { %1013 = vrot.lane.b32.xlu0 %v3215_v35, %s2897_s5  ;;  %1015 = vrot.lane.b32.xlu1 %v3260_v44, %s2897_s5 }
  0x45   : > { %2621 = vmatmul.msk.f32.gmra.mxu1 %vm647_vm2, %v3135_v17  ;;  %2556 = vmatmul.msk.f32.gmra.mxu0 %vm647_vm2, %v3135_v17 }
  0x48   : > { %1017 = vrot.lane.b32.xlu2 %v3257_v43, %s2897_s5 }
  0x4a   : > { %2639 = vmatmul.msk.f32.gmra.mxu2 %vm1332_vm3, %v1251_v20 }
  0x4b   : > { %1019 = vrot.lane.b32.xlu0 %v3239_v40, %s2897_s5  ;;  %1021 = vrot.lane.b32.xlu1 %v877_v51, %s2897_s5 }
  0x4d   : > { %2622 = vmatmul.msk.f32.gmra.mxu1 %vm647_vm2, %v3144_v19  ;;  %2557 = vmatmul.msk.f32.gmra.mxu0 %vm647_vm2, %v3144_v19 }
  0x50   : > { %1023 = vrot.lane.b32.xlu2 %v878_v50, %s2897_s5  ;;  %v889_v50 = vld [vmem:[%s3079_s30 + $0xe0] sm:$0xff] }
  0x52   : > { %2640 = vmatmul.msk.f32.gmra.mxu2 %vm1332_vm3, %v1252_v22 }
  0x53   : > { %1025 = vrot.lane.b32.xlu0 %v879_v45, %s2897_s5  ;;  %1027 = vrot.lane.b32.xlu1 %v880_v58, %s2897_s5 }
  0x55   : > { %2623 = vmatmul.msk.f32.gmra.mxu1 %vm647_vm2, %v3153_v21  ;;  %2558 = vmatmul.msk.f32.gmra.mxu0 %vm647_vm2, %v3153_v21 }
  0x58   : > { %1029 = vrot.lane.b32.xlu2 %v881_v57, %s2897_s5 }
  0x5a   : > { %2641 = vmatmul.msk.f32.gmra.mxu2 %vm1332_vm3, %v1253_v25 }
  0x5b   : > { %1031 = vrot.lane.b32.xlu0 %v882_v53, %s2897_s5  ;;  %1033 = vrot.lane.b32.xlu1 %v883_v63, %s2897_s5 }
  0x5d   : > { %2624 = vmatmul.msk.f32.gmra.mxu1 %vm647_vm2, %v3167_v24  ;;  %2559 = vmatmul.msk.f32.gmra.mxu0 %vm647_vm2, %v3167_v24 }
  0x60   : > { %1035 = vrot.lane.b32.xlu2 %v884_v62, %s2897_s5 }
  0x62   : > { %2642 = vmatmul.msk.f32.gmra.mxu2 %vm1332_vm3, %v1254_v29  ;;  %v3346_v29 = vld [vmem:[%s4114_s7] ss:$0 sm:$0xff] }
  0x63   : > { %1037 = vrot.lane.b32.xlu0 %v885_v59, %s2897_s5  ;;  %1039 = vrot.lane.b32.xlu1 %v886_v13, %s2897_s5 }
  0x65   : > { %2625 = vmatmul.msk.f32.gmra.mxu1 %vm647_vm2, %v3186_v28  ;;  %2560 = vmatmul.msk.f32.gmra.mxu0 %vm647_vm2, %v3186_v28 }
  0x68   : > { %1041 = vrot.lane.b32.xlu2 %v887_v9, %s2897_s5 }
  0x6a   : > { %2643 = vmatmul.msk.f32.gmra.mxu2 %vm1332_vm3, %v1255_v32 }
  0x6b   : > { %1043 = vrot.lane.b32.xlu0 %v888_v0, %s2897_s5  ;;  %1045 = vrot.lane.b32.xlu1 %v889_v50, %s2897_s5 }
  0x6d   : > { %2626 = vmatmul.msk.f32.gmra.mxu1 %vm647_vm2, %v3200_v31  ;;  %2561 = vmatmul.msk.f32.gmra.mxu0 %vm647_vm2, %v3200_v31 }
  0x70   : > { %1047 = vrot.lane.b32.xlu2 %v890_v48, %s2897_s5 }
  0x72   : > { %2644 = vmatmul.msk.f32.gmra.mxu2 %vm1332_vm3, %v1256_v37 }
  0x73   : > { %1049 = vrot.lane.b32.xlu0 %v891_v16, %s2897_s5 }
  0x75   : > { %2627 = vmatmul.msk.f32.gmra.mxu1 %vm647_vm2, %v3224_v36  ;;  %2562 = vmatmul.msk.f32.gmra.mxu0 %vm647_vm2, %v3224_v36 }
  0x7a   : > { %2645 = vmatmul.msk.f32.gmra.mxu2 %vm1332_vm3, %v1257_v42  ;;  %v2898_v42 = vmov 0.0  }
  0x7d   : > { %2628 = vmatmul.msk.f32.gmra.mxu1 %vm647_vm2, %v3248_v41  ;;  %2563 = vmatmul.msk.f32.gmra.mxu0 %vm647_vm2, %v3248_v41 }
  0x82   : > { %2646 = vmatmul.msk.f32.gmra.mxu2 %vm1332_vm3, %v1258_v47  ;;  %v2899_v47 = vmov 0  }
  0x83   : > { %2773 = vset.pattern.permute.xlu0 %v2899_v47  ;;  %2767 = vset.pattern.permute.xlu2 %v2899_v47 }
  0x84   : > { %2774 = vset.pattern.permute.xlu1 %v2899_v47 }
  0x85   : > { %2629 = vmatmul.msk.f32.gmra.mxu1 %vm647_vm2, %v3269_v46  ;;  %2564 = vmatmul.msk.f32.gmra.mxu0 %vm647_vm2, %v3269_v46 }
  0x8a   : > { %2647 = vmatmul.msk.f32.gmra.mxu2 %vm1332_vm3, %v1259_v52 }
  0x8d   : > { %2630 = vmatmul.msk.f32.gmra.mxu1 %vm647_vm2, %v3281_v49  ;;  %2565 = vmatmul.msk.f32.gmra.mxu0 %vm647_vm2, %v3281_v49 }
  0x92   : > { %2648 = vmatmul.msk.f32.gmra.mxu2 %vm1332_vm3, %v1260_v60 }
  0x95   : > { %2631 = vmatmul.msk.f32.gmra.mxu1 %vm647_vm2, %v3302_v56  ;;  %2566 = vmatmul.msk.f32.gmra.mxu0 %vm647_vm2, %v3302_v56  ;;  %v990_v3 = vpop.permute.xlu0 %989  ;;  %v994_v60 = vpop.permute.xlu1 %993 }
  0x9a   : > { %2649 = vmatmul.msk.f32.gmra.mxu2 %vm1332_vm3, %v1261_v1 }
  0x9d   : > { %2632 = vmatmul.msk.f32.gmra.mxu1 %vm647_vm2, %v3317_v61  ;;  %2567 = vmatmul.msk.f32.gmra.mxu0 %vm647_vm2, %v3317_v61  ;;  %v992_v53 = vpop.permute.xlu0 %991  ;;  %v996_v47 = vpop.permute.xlu1 %995 }
  0xa2   : > { %v1284_v4 = vpop.f32.mrf.mxu1  ;;  %v765_v6 = vpop.f32.mrf.mxu0 }
  0xa3   : > { %v766_v18 = vadd.f32 %v3331_v2, %v765_v6 }
  0xa5   : > { %2667 = vmatmul.msk.f32.vlgmr.msrb.gmra.mxu1 %vm647_vm2, %v3068_v5  ;;  %v893_v20 = vadd.f32 %v3088_v7, %v766_v18  ;;  %v925_v22 = vsub.f32 0.0, %v766_v18  ;;  %v1402_v32 = vpop.f32.mrf.mxu2 }
  0xa6   : > { %v1403_v5 = vadd.f32 %v1402_v32, %v1284_v4  ;;  %v892_v4 = vld [vmem:[%s3079_s30 + $0xf8] sm:$0xff] }
  0xa7   : > { %v1085_v25 = vadd.f32 %v990_v3, %v925_v22  ;;  %1051 = vrot.lane.b32.xlu1 %v892_v4, %s2897_s5  ;;  %s2423_s5 = scalar_lea.hbm %s4124_s17, %s2720_s23 }
  0xa8   : > { %v1454_v52 = vadd.f32 %v3346_v29, %v1403_v5  ;;  %s2426_s28 = sshll.u32 %s2423_s5, 4  ;;  %s2427_s28 = int_to_ptr.hbm [resolvable:$true] %s2426_s28 }
  0xa9   : > { %vm1117_vm5 = vcmp.ge.f32.partialorder %v893_v20, %v1085_v25  ;;  %s2847_s18 = sshra.s32 %s2427_s28, 4  ;;  %s2848_s18 = int_to_ptr.hbm [resolvable:$true] %s2847_s18 }
  0xaa   : > { %v1287_v37 = vpop.f32.mrf.mxu1  ;;  %v768_v7 = vpop.f32.mrf.mxu0  ;;  %v2584_v45 = vsel %vm1117_vm5, 1.0, %v2898_v42  ;;  %v1470_v57 = vmax.f32 %v1454_v52, 0.0  ;;  %s2849_s25 = scalar_lea.hbm %s2848_s18, 128  ;;  %p2854_p1 = scmp.lt.s32.totalorder %s2848_s18, %s4124_s17 }
  0xab   : > { %v769_v51 = vadd.f32 %v3331_v2, %v768_v7  ;;  %1214 = vst.msk [vmem:[%s3352_s6] sm:$0xff] %vm1213_vm4, %v2584_v45  ;;  %v2080_v62 = vsub.f32 1.0, %v2584_v45  ;;  %p2850_p12 = scmp.ne.s32.totalorder %s2848_s18, %s2849_s25 }
  0xac   : > { %2650 = vmatmul.msk.f32.vlgmr.msra.gmra.mxu3 %vm1492_vm6, %v1470_v57 }
  0xad   : > { %2668 = vmatmul.msk.f32.gmra.mxu1 %vm647_vm2, %v3093_v8  ;;  %v894_v54 = vadd.f32 %v3105_v11, %v769_v51  ;;  %v926_v55 = vsub.f32 0.0, %v769_v51  ;;  %v1405_v59 = vpop.f32.mrf.mxu2  ;;  %2098 = vperm.xlu2 %2767, %v2080_v62   ;;  %p2851_p13 = pnand %p2850_p12, %p3035_p5 }
  0xae   : > { %v1406_v63 = vadd.f32 %v1405_v59, %v1287_v37 }
  0xaf   : > { %v1086_v58 = vadd.f32 %v992_v53, %v926_v55  ;;  %v998_v53 = vpop.permute.xlu2 %997  ;;  %p2852_p0 = pneg %p2851_p13 }
  0xb0   : > { %v1455_v6 = vadd.f32 %v3346_v29, %v1406_v63 }
  0xb1   : > { %vm1118_vm7 = vcmp.ge.f32.partialorder %v894_v54, %v1086_v58 }
  0xb2   : > { %v1290_v0 = vpop.f32.mrf.mxu1  ;;  %v771_v1 = vpop.f32.mrf.mxu0  ;;  %v2585_v3 = vsel %vm1118_vm7, 1.0, %v2898_v42  ;;  %v1471_v16 = vmax.f32 %v1455_v6, 0.0 }
  0xb3   : > { %v772_v8 = vadd.f32 %v3331_v2, %v771_v1  ;;  %1215 = vst.msk [vmem:[%s3352_s6 + $0x8] sm:$0xff] %vm1213_vm4, %v2585_v3  ;;  %v2081_v11 = vsub.f32 1.0, %v2585_v3  ;;  %v2768_v22 = vpack.i.bf16 %v2585_v3, %v2584_v45  ;;  %v1711_v1 = vld [vmem:[%s4119_s12] sm:$0xff] }
  0xb4   : > { %2651 = vmatmul.msk.f32.gmra.mxu3 %vm1492_vm6, %v1471_v16  ;;  %1780 = vmatpush.msrb.mxu2 %v1711_v1 }
  0xb5   : > { %2669 = vmatmul.msk.f32.gmra.mxu1 %vm647_vm2, %v3112_v12  ;;  %v895_v9 = vadd.f32 %v3102_v10, %v772_v8  ;;  %v927_v13 = vsub.f32 0.0, %v772_v8  ;;  %2103 = vperm.xlu0 %2773, %v2081_v11   ;;  %v1408_v20 = vpop.f32.mrf.mxu2 }
  0xb6   : > { %v1409_v25 = vadd.f32 %v1408_v20, %v1290_v0  ;;  %2769 = vperm.xlu2 %2767, %v2768_v22  }
  0xb7   : > { %v1087_v18 = vadd.f32 %v994_v60, %v927_v13 }
  0xb8   : > { %v1456_v10 = vadd.f32 %v3346_v29, %v1409_v25 }
  0xb9   : > { %vm1119_vm8 = vcmp.ge.f32.partialorder %v895_v9, %v1087_v18  ;;  %v1000_v9 = vpop.permute.xlu2 %999 }
  0xba   : > { %v1293_v32 = vpop.f32.mrf.mxu1  ;;  %v2586_v5 = vsel %vm1119_vm8, 1.0, %v2898_v42  ;;  %v774_v37 = vpop.f32.mrf.mxu0  ;;  %v1472_v50 = vmax.f32 %v1456_v10, 0.0 }
  0xbb   : > { %1216 = vst.msk [vmem:[%s3352_s6 + $0x10] sm:$0xff] %vm1213_vm4, %v2586_v5  ;;  %v775_v12 = vadd.f32 %v3331_v2, %v774_v37  ;;  %v2082_v7 = vsub.f32 1.0, %v2586_v5 }
  0xbc   : > { %2652 = vmatmul.msk.f32.gmra.mxu3 %vm1492_vm6, %v1472_v50 }
  0xbd   : > { %2670 = vmatmul.msk.f32.gmra.mxu1 %vm647_vm2, %v3126_v15  ;;  %v896_v45 = vadd.f32 %v3121_v14, %v775_v12  ;;  %v928_v48 = vsub.f32 0.0, %v775_v12  ;;  %2108 = vperm.xlu1 %2774, %v2082_v7   ;;  %v1411_v52 = vpop.f32.mrf.mxu2 }
  0xbe   : > { %v1412_v54 = vadd.f32 %v1411_v52, %v1293_v32 }
  0xbf   : > { %v1088_v51 = vadd.f32 %v996_v47, %v928_v48  ;;  %v1002_v48 = vpop.permute.xlu0 %1001 }
  0xc0   : > { %v1457_v14 = vadd.f32 %v3346_v29, %v1412_v54 }
  0xc1   : > { %vm1120_vm9 = vcmp.ge.f32.partialorder %v896_v45, %v1088_v51  ;;  %v1006_v45 = vpop.permute.xlu2 %1005 }
  0xc2   : > { %v1296_v55 = vpop.f32.mrf.mxu1  ;;  %v2587_v57 = vsel %vm1120_vm9, 1.0, %v2898_v42  ;;  %v777_v58 = vpop.f32.mrf.mxu0  ;;  %v1473_v63 = vmax.f32 %v1457_v14, 0.0 }
  0xc3   : > { %1217 = vst.msk [vmem:[%s3352_s6 + $0x18] sm:$0xff] %vm1213_vm4, %v2587_v57  ;;  %v778_v15 = vadd.f32 %v3331_v2, %v777_v58  ;;  %v2775_v59 = vpack.i.bf16 %v2587_v57, %v2586_v5 }
  0xc4   : > { %2653 = vmatmul.msk.f32.gmra.mxu3 %vm1492_vm6, %v1473_v63 }
  0xc5   : > { %2671 = vmatmul.msk.f32.gmra.mxu1 %vm647_vm2, %v3135_v17  ;;  %v897_v60 = vadd.f32 %v3162_v23, %v778_v15  ;;  %2776 = vperm.xlu0 %2773, %v2775_v59   ;;  %v929_v62 = vsub.f32 0.0, %v778_v15  ;;  %v1414_v3 = vpop.f32.mrf.mxu2 }
  0xc6   : > { %v1415_v4 = vadd.f32 %v1414_v3, %v1296_v55 }
  0xc7   : > { %v1089_v0 = vadd.f32 %v998_v53, %v929_v62  ;;  %v2083_v53 = vsub.f32 1.0, %v2587_v57 }
  0xc8   : > { %v1458_v6 = vadd.f32 %v3346_v29, %v1415_v4 }
  0xc9   : > { %vm1121_vm10 = vcmp.ge.f32.partialorder %v897_v60, %v1089_v0  ;;  %2113 = vperm.xlu2 %2767, %v2083_v53   ;;  %v3429_v14 = vpop.permute.xlu2 %1011 }
  0xca   : > { %v1299_v8 = vpop.f32.mrf.mxu1  ;;  %v3400_v11 = vsel %vm1121_vm10, 1.0, %v2898_v42  ;;  %v780_v17 = vpop.f32.mrf.mxu0  ;;  %v1474_v18 = vmax.f32 %v1458_v6, 0.0 }
  0xcb   : > { %1218 = vst.msk [vmem:[%s3352_s6 + $0x20] sm:$0xff] %vm1213_vm4, %v3400_v11  ;;  %v781_v23 = vadd.f32 %v3331_v2, %v780_v17 }
  0xcc   : > { %2654 = vmatmul.msk.f32.gmra.mxu3 %vm1492_vm6, %v1474_v18 }
  0xcd   : > { %2672 = vmatmul.msk.f32.gmra.mxu1 %vm647_vm2, %v3144_v19  ;;  %v898_v13 = vadd.f32 %v3176_v26, %v781_v23  ;;  %v930_v16 = vsub.f32 0.0, %v781_v23  ;;  %v1417_v22 = vpop.f32.mrf.mxu2 }
  0xce   : > { %v1418_v25 = vadd.f32 %v1417_v22, %v1299_v8  ;;  %v1004_v8 = vpop.permute.xlu1 %1003 }
  0xcf   : > { %v1090_v20 = vadd.f32 %v1000_v9, %v930_v16  ;;  %v1008_v16 = vpop.permute.xlu0 %1007 }
  0xd0   : > { %v1459_v26 = vadd.f32 %v3346_v29, %v1418_v25 }
  0xd1   : > { %vm1122_vm11 = vcmp.ge.f32.partialorder %v898_v13, %v1090_v20  ;;  %v2084_v20 = vsub.f32 1.0, %v3400_v11 }
  0xd2   : > { %v1302_v32 = vpop.f32.mrf.mxu1  ;;  %v2589_v5 = vsel %vm1122_vm11, 1.0, %v2898_v42  ;;  %v783_v37 = vpop.f32.mrf.mxu0  ;;  %v1475_v7 = vmax.f32 %v1459_v26, 0.0 }
  0xd3   : > { %1219 = vst.msk [vmem:[%s3352_s6 + $0x28] sm:$0xff] %vm1213_vm4, %v2589_v5  ;;  %v784_v12 = vadd.f32 %v3331_v2, %v783_v37  ;;  %v2780_v19 = vpack.i.bf16 %v2589_v5, %v3400_v11  ;;  %v2085_v52 = vsub.f32 1.0, %v2589_v5  ;;  %2118 = vperm.xlu0 %2773, %v2084_v20  }
  0xd4   : > { %2655 = vmatmul.msk.f32.gmra.mxu3 %vm1492_vm6, %v1475_v7 }
  0xd5   : > { %2673 = vmatmul.msk.f32.gmra.mxu1 %vm647_vm2, %v3153_v21  ;;  %2781 = vperm.xlu1 %2774, %v2780_v19   ;;  %v899_v10 = vadd.f32 %v3179_v27, %v784_v12  ;;  %v931_v47 = vsub.f32 0.0, %v784_v12  ;;  %v1420_v51 = vpop.f32.mrf.mxu2  ;;  %v3446_v12 = vpop.permute.xlu2 %1017 }
  0xd6   : > { %v1421_v54 = vadd.f32 %v1420_v51, %v1302_v32 }
  0xd7   : > { %v1091_v50 = vadd.f32 %v1002_v48, %v931_v47 }
  0xd8   : > { %v1460_v15 = vadd.f32 %v3346_v29, %v1421_v54 }
  0xd9   : > { %vm1123_vm12 = vcmp.ge.f32.partialorder %v899_v10, %v1091_v50 }
  0xda   : > { %v1305_v55 = vpop.f32.mrf.mxu1  ;;  %v786_v58 = vpop.f32.mrf.mxu0  ;;  %v2590_v21 = vsel %vm1123_vm12, 1.0, %v2898_v42  ;;  %v1476_v27 = vmax.f32 %v1460_v15, 0.0 }
  0xdb   : > { %1220 = vst.msk [vmem:[%s3352_s6 + $0x30] sm:$0xff] %vm1213_vm4, %v2590_v21  ;;  %v787_v59 = vadd.f32 %v3331_v2, %v786_v58  ;;  %v2086_v60 = vsub.f32 1.0, %v2590_v21 }
  0xdc   : > { %2656 = vmatmul.msk.f32.gmra.mxu3 %vm1492_vm6, %v1476_v27  ;;  %v1010_v27 = vpop.permute.xlu1 %1009 }
  0xdd   : > { %2674 = vmatmul.msk.f32.gmra.mxu1 %vm647_vm2, %v3167_v24  ;;  %2123 = vperm.xlu1 %2774, %v2085_v52   ;;  %v1423_v57 = vpop.f32.mrf.mxu2  ;;  %v900_v1 = vadd.f32 %v3209_v33, %v787_v59  ;;  %v932_v24 = vsub.f32 0.0, %v787_v59  ;;  %v3461_v58 = vpop.permute.xlu2 %1023 }
  0xde   : > { %v1424_v62 = vadd.f32 %v1423_v57, %v1305_v55  ;;  %2128 = vperm.xlu2 %2767, %v2086_v60  }
  0xdf   : > { %v1092_v6 = vadd.f32 %v1004_v8, %v932_v24 }
  0xe0   : > { %v1461_v4 = vadd.f32 %v3346_v29, %v1424_v62 }
  0xe1   : > { %vm1124_vm13 = vcmp.ge.f32.partialorder %v900_v1, %v1092_v6 }
  0xe2   : > { %v1308_v63 = vpop.f32.mrf.mxu1  ;;  %v789_v0 = vpop.f32.mrf.mxu0  ;;  %v1477_v9 = vmax.f32 %v1461_v4, 0.0  ;;  %v2591_v33 = vsel %vm1124_vm13, 1.0, %v2898_v42 }
  0xe3   : > { %v790_v3 = vadd.f32 %v3331_v2, %v789_v0  ;;  %1221 = vst.msk [vmem:[%s3352_s6 + $0x38] sm:$0xff] %vm1213_vm4, %v2591_v33  ;;  %v2087_v48 = vsub.f32 1.0, %v2591_v33 }
  0xe4   : > { %2657 = vmatmul.msk.f32.gmra.mxu3 %vm1492_vm6, %v1477_v9  ;;  %v1016_v9 = vpop.permute.xlu1 %1015 }
  0xe5   : > { %2675 = vmatmul.msk.f32.gmra.mxu1 %vm647_vm2, %v3186_v28  ;;  %v901_v17 = vadd.f32 %v3212_v34, %v790_v3  ;;  %v933_v23 = vsub.f32 0.0, %v790_v3  ;;  %v1426_v18 = vpop.f32.mrf.mxu2  ;;  %v2785_v28 = vpack.i.bf16 %v2591_v33, %v2590_v21  ;;  %2133 = vperm.xlu0 %2773, %v2087_v48  }
  0xe6   : > { %v1427_v22 = vadd.f32 %v1426_v18, %v1308_v63 }
  0xe7   : > { %v1093_v13 = vadd.f32 %v1006_v45, %v933_v23  ;;  %2786 = vperm.xlu2 %2767, %v2785_v28   ;;  %v1014_v45 = vpop.permute.xlu0 %1013  ;;  %v3475_v23 = vpop.permute.xlu2 %1029 }
  0xe8   : > { %v1462_v19 = vadd.f32 %v3346_v29, %v1427_v22 }
  0xe9   : > { %vm1125_vm14 = vcmp.ge.f32.partialorder %v901_v17, %v1093_v13 }
  0xea   : > { %v1311_v34 = vpop.f32.mrf.mxu1  ;;  %v2592_v25 = vsel %vm1125_vm14, 1.0, %v2898_v42  ;;  %v792_v32 = vpop.f32.mrf.mxu0  ;;  %v1478_v7 = vmax.f32 %v1462_v19, 0.0 }
  0xeb   : > { %1222 = vst.msk [vmem:[%s3352_s6 + $0x40] sm:$0xff] %vm1213_vm4, %v2592_v25  ;;  %v793_v5 = vadd.f32 %v3331_v2, %v792_v32  ;;  %v2088_v37 = vsub.f32 1.0, %v2592_v25 }
  0xec   : > { %2658 = vmatmul.msk.f32.gmra.mxu3 %vm1492_vm6, %v1478_v7 }
  0xed   : > { %2676 = vmatmul.msk.f32.gmra.mxu1 %vm647_vm2, %v3200_v31  ;;  %v902_v11 = vadd.f32 %v3195_v30, %v793_v5  ;;  %2138 = vperm.xlu1 %2774, %v2088_v37   ;;  %v934_v26 = vsub.f32 0.0, %v793_v5  ;;  %v1429_v47 = vpop.f32.mrf.mxu2 }
  0xee   : > { %v1430_v50 = vadd.f32 %v1429_v47, %v1311_v34 }
  0xef   : > { %v1094_v10 = vadd.f32 %v1008_v16, %v934_v26  ;;  %v3489_v37 = vpop.permute.xlu2 %1035 }
  0xf0   : > { %v1463_v54 = vadd.f32 %v3346_v29, %v1430_v50 }
  0xf1   : > { %vm1126_vm15 = vcmp.ge.f32.partialorder %v902_v11, %v1094_v10  ;;  %v3495_v10 = vpop.permute.xlu1 %1021 }
  0xf2   : > { %v1314_v51 = vpop.f32.mrf.mxu1  ;;  %v2593_v52 = vsel %vm1126_vm15, 1.0, %v2898_v42  ;;  %v795_v53 = vpop.f32.mrf.mxu0  ;;  %v1479_v15 = vmax.f32 %v1463_v54, 0.0 }
  0xf3   : > { %1223 = vst.msk [vmem:[%s3352_s6 + $0x48] sm:$0xff] %vm1213_vm4, %v2593_v52  ;;  %v796_v31 = vadd.f32 %v3331_v2, %v795_v53  ;;  %v2790_v30 = vpack.i.bf16 %v2593_v52, %v2592_v25  ;;  %v2089_v13 = vsub.f32 1.0, %v2593_v52  ;;  %v1849_v53 = vld [vmem:[%s4121_s14 + $0x18] sm:$0xff] }
  0xf4   : > { %2659 = vmatmul.msk.f32.gmra.mxu3 %vm1492_vm6, %v1479_v15 }
  0xf5   : > { %2677 = vmatmul.msk.f32.gmra.mxu1 %vm647_vm2, %v3224_v36  ;;  %v903_v55 = vadd.f32 %v3236_v39, %v796_v31  ;;  %2791 = vperm.xlu1 %2774, %v2790_v30   ;;  %v935_v21 = vsub.f32 0.0, %v796_v31  ;;  %v1432_v57 = vpop.f32.mrf.mxu2  ;;  %v3468_v39 = vpop.permute.xlu0 %1019 }
  0xf6   : > { %v1433_v60 = vadd.f32 %v1432_v57, %v1314_v51  ;;  %2143 = vperm.xlu2 %2767, %v2089_v13   ;;  %1915 = vmatpush.msrb.mxu3 %v1849_v53 }
  0xf7   : > { %v1095_v59 = vadd.f32 %v1010_v27, %v935_v21 }
  0xf8   : > { %v1464_v3 = vadd.f32 %v3346_v29, %v1433_v60 }
  0xf9   : > { %vm1127_vm0 = vcmp.ge.f32.partialorder %v903_v55, %v1095_v59  ;;  %v3517_v60 = vpop.permute.xlu1 %1027 }
  0xfa   : > { %v1317_v62 = vpop.f32.mrf.mxu1  ;;  %v798_v63 = vpop.f32.mrf.mxu0  ;;  %v2594_v0 = vsel %vm1127_vm0, 1.0, %v2898_v42  ;;  %v1480_v8 = vmax.f32 %v1464_v3, 0.0 }
  0xfb   : > { %v799_v36 = vadd.f32 %v3331_v2, %v798_v63  ;;  %1224 = vst.msk [vmem:[%s3352_s6 + $0x50] sm:$0xff] %vm1213_vm4, %v2594_v0  ;;  %v2090_v1 = vsub.f32 1.0, %v2594_v0 }
  0xfc   : > { %2660 = vmatmul.msk.f32.gmra.mxu3 %vm1492_vm6, %v1480_v8 }
  0xfd   : > { %2678 = vmatmul.msk.f32.gmra.mxu1 %vm647_vm2, %v3248_v41  ;;  %v904_v24 = vadd.f32 %v3233_v38, %v799_v36  ;;  %v936_v4 = vsub.f32 0.0, %v799_v36  ;;  %2148 = vperm.xlu0 %2773, %v2090_v1   ;;  %v1435_v6 = vpop.f32.mrf.mxu2  ;;  %v3486_v34 = vpop.permute.xlu0 %1025 }
  0xfe   : > { %v1436_v16 = vadd.f32 %v1435_v6, %v1317_v62 }
  0xff   : > { %v1096_v17 = vadd.f32 %v3429_v14, %v936_v4 }
 0x100   : > { %v1465_v14 = vadd.f32 %v3346_v29, %v1436_v16 }
 0x101   : > { %vm1128_vm1 = vcmp.ge.f32.partialorder %v904_v24, %v1096_v17 }
 0x102   : > { %v1320_v33 = vpop.f32.mrf.mxu1  ;;  %v2595_v41 = vsel %vm1128_vm1, 1.0, %v2898_v42  ;;  %v801_v18 = vpop.f32.mrf.mxu0  ;;  %v1481_v25 = vmax.f32 %v1465_v14, 0.0 }
 0x103   : > { %1225 = vst.msk [vmem:[%s3352_s6 + $0x58] sm:$0xff] %vm1213_vm4, %v2595_v41  ;;  %v802_v38 = vadd.f32 %v3331_v2, %v801_v18  ;;  %v2091_v20 = vsub.f32 1.0, %v2595_v41  ;;  %v2795_v19 = vpack.i.bf16 %v2595_v41, %v2594_v0  ;;  %v3539_v41 = vpop.permute.xlu1 %1033 }
 0x104   : > { %2661 = vmatmul.msk.f32.gmra.mxu3 %vm1492_vm6, %v1481_v25 }
 0x105   : > { %2679 = vmatmul.msk.f32.gmra.mxu1 %vm647_vm2, %v3269_v46  ;;  %v905_v28 = vadd.f32 %v3215_v35, %v802_v38  ;;  %v937_v22 = vsub.f32 0.0, %v802_v38  ;;  %2153 = vperm.xlu1 %2774, %v2091_v20   ;;  %v1438_v5 = vpop.f32.mrf.mxu2  ;;  %v3501_v52 = vpop.permute.xlu0 %1031 }
 0x106   : > { %v1439_v11 = vadd.f32 %v1438_v5, %v1320_v33  ;;  %2796 = vperm.xlu2 %2767, %v2795_v19   ;;  %v3536_v33 = vld [vmem:[%s4118_s11] ss:$0 sm:$0xff] }
 0x107   : > { %v1097_v32 = vadd.f32 %v1014_v45, %v937_v22 }
 0x108   : > { %v1466_v47 = vadd.f32 %v3346_v29, %v1439_v11 }
 0x109   : > { %vm1129_vm3 = vcmp.ge.f32.partialorder %v905_v28, %v1097_v32 }
 0x10a   : > { %v1323_v26 = vpop.f32.mrf.mxu1  ;;  %v2596_v46 = vsel %vm1129_vm3, 1.0, %v2898_v42  ;;  %v804_v7 = vpop.f32.mrf.mxu0  ;;  %v1482_v50 = vmax.f32 %v1466_v47, 0.0 }
 0x10b   : > { %1226 = vst.msk [vmem:[%s3352_s6 + $0x60] sm:$0xff] %vm1213_vm4, %v2596_v46  ;;  %v805_v35 = vadd.f32 %v3331_v2, %v804_v7  ;;  %v2092_v63 = vsub.f32 1.0, %v2596_v46  ;;  %v3553_v19 = vpop.permute.xlu1 %1039 }
 0x10c   : > { %2662 = vmatmul.msk.f32.gmra.mxu3 %vm1492_vm6, %v1482_v50 }
 0x10d   : > { %2680 = vmatmul.msk.f32.gmra.mxu1 %vm647_vm2, %v3281_v49  ;;  %v906_v45 = vadd.f32 %v3260_v44, %v805_v35  ;;  %v938_v48 = vsub.f32 0.0, %v805_v35  ;;  %v1441_v31 = vpop.f32.mrf.mxu2  ;;  %v3510_v44 = vpop.permute.xlu2 %1041  ;;  %v1848_v35 = vld [vmem:[%s4121_s14 + $0x10] sm:$0xff] }
 0x10e   : > { %v1442_v30 = vadd.f32 %v1441_v31, %v1323_v26  ;;  %2158 = vperm.xlu2 %2767, %v2092_v63   ;;  %v3521_v1 = vpop.permute.xlu0 %1037  ;;  %1916 = vmatpush.msrb.mxu3 %v1848_v35 }
 0x10f   : > { %v1098_v51 = vadd.f32 %v1016_v9, %v938_v48 }
 0x110   : > { %v1467_v27 = vadd.f32 %v3346_v29, %v1442_v30 }
 0x111   : > { %vm1130_vm5 = vcmp.ge.f32.partialorder %v906_v45, %v1098_v51 }
 0x112   : > { %v1326_v54 = vpop.f32.mrf.mxu1  ;;  %v2597_v49 = vsel %vm1130_vm5, 1.0, %v2898_v42  ;;  %v807_v55 = vpop.f32.mrf.mxu0  ;;  %v1483_v62 = vmax.f32 %v1467_v27, 0.0 }
 0x113   : > { %1227 = vst.msk [vmem:[%s3352_s6 + $0x68] sm:$0xff] %vm1213_vm4, %v2597_v49  ;;  %v808_v21 = vadd.f32 %v3331_v2, %v807_v55  ;;  %v2800_v15 = vpack.i.bf16 %v2597_v49, %v2596_v46  ;;  %v2093_v4 = vsub.f32 1.0, %v2597_v49  ;;  %v3568_v51 = vpop.permute.xlu1 %1045 }
 0x114   : > { %2663 = vmatmul.msk.f32.gmra.mxu3 %vm1492_vm6, %v1483_v62 }
 0x115   : > { %2681 = vmatmul.msk.f32.gmra.mxu1 %vm647_vm2, %v3302_v56  ;;  %v907_v59 = vadd.f32 %v3257_v43, %v808_v21  ;;  %v939_v57 = vsub.f32 0.0, %v808_v21  ;;  %2801 = vperm.xlu0 %2773, %v2800_v15   ;;  %v1444_v36 = vpop.f32.mrf.mxu2  ;;  %v3530_v6 = vpop.permute.xlu2 %1047 }
 0x116   : > { %v1445_v3 = vadd.f32 %v1444_v36, %v1326_v54  ;;  %v3546_v14 = vpop.permute.xlu0 %1043 }
 0x117   : > { %v1099_v0 = vadd.f32 %v3446_v12, %v939_v57 }
 0x118   : > { %v1468_v12 = vadd.f32 %v3346_v29, %v1445_v3 }
 0x119   : > { %vm1131_vm7 = vcmp.ge.f32.partialorder %v907_v59, %v1099_v0 }
 0x11a   : > { %v1329_v56 = vpop.f32.mrf.mxu1  ;;  %v2598_v43 = vsel %vm1131_vm7, 1.0, %v2898_v42  ;;  %v810_v24 = vpop.f32.mrf.mxu0  ;;  %v1484_v16 = vmax.f32 %v1468_v12, 0.0 }
 0x11b   : > { %1228 = vst.msk [vmem:[%s3352_s6 + $0x70] sm:$0xff] %vm1213_vm4, %v2598_v43  ;;  %v811_v8 = vadd.f32 %v3331_v2, %v810_v24  ;;  %v2094_v17 = vsub.f32 1.0, %v2598_v43  ;;  %v3579_v63 = vpop.permute.xlu1 %1051 }
 0x11c   : > { %2664 = vmatmul.msk.f32.gmra.mxu3 %vm1492_vm6, %v1484_v16 }
 0x11d   : > { %2682 = vmatmul.msk.f32.gmra.mxu1 %vm647_vm2, %v3317_v61  ;;  %v908_v9 = vadd.f32 %v3239_v40, %v811_v8  ;;  %v940_v13 = vsub.f32 0.0, %v811_v8  ;;  %2168 = vperm.xlu1 %2774, %v2094_v17   ;;  %v1447_v61 = vpop.f32.mrf.mxu2  ;;  %v3550_v5 = vpop.permute.xlu2 %2098 }
 0x11e   : > { %2163 = vperm.xlu0 %2773, %v2093_v4   ;;  %v1448_v18 = vadd.f32 %v1447_v61, %v1329_v56  ;;  %v3556_v7 = vpop.permute.xlu0 %1049 }
 0x11f   : > { %v1100_v2 = vadd.f32 %v3468_v39, %v940_v13 }
 0x120   : > { %v1469_v39 = vadd.f32 %v3346_v29, %v1448_v18  ;;  %v3562_v29 = vld [vmem:[%s4116_s9] ss:$0 sm:$0xff] }
 0x121   : > { %vm1132_vm8 = vcmp.ge.f32.partialorder %v908_v9, %v1100_v2 }
 0x122   : > { %v1647_v38 = vpop.f32.mrf.mxu1  ;;  %v2599_v40 = vsel %vm1132_vm8, 1.0, %v2898_v42  ;;  %v1485_v32 = vmax.f32 %v1469_v39, 0.0  ;;  %v1847_v39 = vld [vmem:[%s4121_s14 + $0x8] sm:$0xff] }
 0x123   : > { %v1648_v20 = vadd.f32 %v3536_v33, %v1647_v38  ;;  %1229 = vst.msk [vmem:[%s3352_s6 + $0x78] sm:$0xff] %vm1213_vm4, %v2599_v40  ;;  %v2805_v28 = vpack.i.bf16 %v2599_v40, %v2598_v43  ;;  %v2095_v22 = vsub.f32 1.0, %v2599_v40  ;;  %1917 = vmatpush.msrb.mxu3 %v1847_v39 }
 0x124   : > { %2665 = vmatmul.msk.f32.gmra.mxu3 %vm1492_vm6, %v1485_v32 }
 0x125   : > { %v1695_v25 = vmax.f32 %v1648_v20, 0.0  ;;  %2806 = vperm.xlu1 %2774, %v2805_v28   ;;  %2173 = vperm.xlu2 %2767, %v2095_v22   ;;  %v2770_v47 = vpop.permute.xlu2 %2769 }
 0x126   : > { %v2771_v31 = vunpack.i.l.bf16 %v2770_v47  ;;  %v2772_v59 = vunpack.i.h.bf16 %v2770_v47 }
 0x127   : > { %2683 = vmatmul.msk.f32.vlgmr.msrb.gmra.mxu2 %vm1492_vm6, %v1695_v25  ;;  %v3572_v49 = vpop.permute.xlu0 %2103 }
 0x12a   : > { %v1650_v11 = vpop.f32.mrf.mxu1 }
 0x12b   : > { %v1651_v26 = vadd.f32 %v3536_v33, %v1650_v11 }
 0x12d   : > { %v1696_v46 = vmax.f32 %v1651_v26, 0.0  ;;  %v3595_v20 = vpop.permute.xlu2 %2113 }
 0x12f   : > { %2684 = vmatmul.msk.f32.gmra.mxu2 %vm1492_vm6, %v1696_v46  ;;  %v1558_v48 = vpop.f32.mrf.mxu3  ;;  %v3588_v9 = vpop.permute.xlu1 %2108 }
 0x130   : > { %v1559_v53 = vadd.f32 %v3562_v29, %v1558_v48 }
 0x132   : > { %v1653_v45 = vpop.f32.mrf.mxu1  ;;  %v1606_v54 = vmax.f32 %v1559_v53, 0.0 }
 0x133   : > { %v1654_v50 = vadd.f32 %v3536_v33, %v1653_v45 }
 0x134   : > { %v3574_v55 = vmul.f32 %v2771_v31, %v1606_v54  ;;  %2224 = vrot.lane.b32.xlu0 %v1606_v54, %s2900_s0 }
 0x135   : > { %v1697_v30 = vmax.f32 %v1654_v50, 0.0 }
 0x137   : > { %2685 = vmatmul.msk.f32.gmra.mxu2 %vm1492_vm6, %v1697_v30  ;;  %v1561_v15 = vpop.f32.mrf.mxu3  ;;  %v2777_v3 = vpop.permute.xlu0 %2776 }
 0x138   : > { %v1562_v57 = vadd.f32 %v3562_v29, %v1561_v15  ;;  %v2778_v8 = vunpack.i.l.bf16 %v2777_v3  ;;  %v2779_v18 = vunpack.i.h.bf16 %v2777_v3  ;;  %v3607_v48 = vpop.permute.xlu2 %2128 }
 0x13a   : > { %v1656_v21 = vpop.f32.mrf.mxu1  ;;  %v1607_v0 = vmax.f32 %v1562_v57, 0.0 }
 0x13b   : > { %v1657_v27 = vadd.f32 %v3536_v33, %v1656_v21 }
 0x13c   : > { %v3582_v36 = vmul.f32 %v2772_v59, %v1607_v0  ;;  %2226 = vrot.lane.b32.xlu1 %v1607_v0, %s2900_s0 }
 0x13d   : > { %v1698_v62 = vmax.f32 %v1657_v27, 0.0 }
 0x13f   : > { %2686 = vmatmul.msk.f32.gmra.mxu2 %vm1492_vm6, %v1698_v62  ;;  %v1564_v43 = vpop.f32.mrf.mxu3 }
 0x140   : > { %v1565_v4 = vadd.f32 %v3562_v29, %v1564_v43 }
 0x141   : > { %v2787_v62 = vpop.permute.xlu2 %2786 }
 0x142   : > { %v1659_v56 = vpop.f32.mrf.mxu1  ;;  %v1608_v12 = vmax.f32 %v1565_v4, 0.0 }
 0x143   : > { %v1660_v24 = vadd.f32 %v3536_v33, %v1659_v56 }
 0x144   : > { %v3590_v13 = vmul.f32 %v2778_v8, %v1608_v12  ;;  %2228 = vrot.lane.b32.xlu2 %v1608_v12, %s2900_s0 }
 0x145   : > { %v1699_v17 = vmax.f32 %v1660_v24, 0.0  ;;  %v2788_v24 = vunpack.i.l.bf16 %v2787_v62 }
 0x147   : > { %2687 = vmatmul.msk.f32.gmra.mxu2 %vm1492_vm6, %v1699_v17  ;;  %v1567_v2 = vpop.f32.mrf.mxu3  ;;  %v2782_v25 = vpop.permute.xlu1 %2781 }
 0x148   : > { %v1568_v38 = vadd.f32 %v3562_v29, %v1567_v2  ;;  %v2783_v35 = vunpack.i.l.bf16 %v2782_v25  ;;  %v2784_v54 = vunpack.i.h.bf16 %v2782_v25  ;;  %v1846_v25 = vld [vmem:[%s4121_s14] sm:$0xff] }
 0x149   : > { %1918 = vmatpush.msrb.mxu3 %v1846_v25 }
 0x14a   : > { %v1662_v16 = vpop.f32.mrf.mxu1  ;;  %v1609_v28 = vmax.f32 %v1568_v38, 0.0 }
 0x14b   : > { %v1663_v61 = vadd.f32 %v3536_v33, %v1662_v16 }
 0x14c   : > { %v3598_v22 = vmul.f32 %v2779_v18, %v1609_v28  ;;  %2230 = vrot.lane.b32.xlu0 %v1609_v28, %s2900_s0  ;;  %v2789_v18 = vunpack.i.h.bf16 %v2787_v62 }
 0x14d   : > { %v1700_v40 = vmax.f32 %v1663_v61, 0.0 }
 0x14f   : > { %2688 = vmatmul.msk.f32.gmra.mxu2 %vm1492_vm6, %v1700_v40  ;;  %v1570_v11 = vpop.f32.mrf.mxu3  ;;  %v3614_v27 = vpop.permute.xlu1 %2123 }
 0x150   : > { %v1571_v46 = vadd.f32 %v3562_v29, %v1570_v11 }
 0x152   : > { %v1665_v32 = vpop.f32.mrf.mxu1  ;;  %v1610_v45 = vmax.f32 %v1571_v46, 0.0 }
 0x153   : > { %v1666_v26 = vadd.f32 %v3536_v33, %v1665_v32  ;;  %v626_v32 = vld [vmem:[%s3065_s1 + $0x80] sm:$0xff] }
 0x154   : > { %v3609_v50 = vmul.f32 %v2783_v35, %v1610_v45  ;;  %2232 = vrot.lane.b32.xlu1 %v1610_v45, %s2900_s0  ;;  %2568 = vmatmul.msk.f32.gmra.mxu0 %vm647_vm2, %v626_v32 }
 0x155   : > { %v1701_v47 = vmax.f32 %v1666_v26, 0.0 }
 0x157   : > { %2689 = vmatmul.msk.f32.gmra.mxu2 %vm1492_vm6, %v1701_v47  ;;  %v1573_v31 = vpop.f32.mrf.mxu3  ;;  %v3640_v47 = vpop.permute.xlu0 %2118 }
 0x158   : > { %v1574_v21 = vadd.f32 %v3562_v29, %v1573_v31 }
 0x15a   : > { %v1668_v53 = vpop.f32.mrf.mxu1  ;;  %v1611_v59 = vmax.f32 %v1574_v21, 0.0 }
 0x15b   : > { %v1669_v30 = vadd.f32 %v3536_v33, %v1668_v53 }
 0x15c   : > { %v3617_v57 = vmul.f32 %v2784_v54, %v1611_v59  ;;  %2234 = vrot.lane.b32.xlu2 %v1611_v59, %s2900_s0  ;;  %v3644_v54 = vpop.permute.xlu2 %2143 }
 0x15d   : > { %v1702_v15 = vmax.f32 %v1669_v30, 0.0 }
 0x15f   : > { %2690 = vmatmul.msk.f32.gmra.mxu2 %vm1492_vm6, %v1702_v15  ;;  %v1576_v3 = vpop.f32.mrf.mxu3  ;;  %v3623_v17 = vpop.permute.xlu1 %2138  ;;  %v627_v15 = vld [vmem:[%s3065_s1 + $0x88] sm:$0xff] }
 0x160   : > { %v1577_v43 = vadd.f32 %v3562_v29, %v1576_v3  ;;  %2569 = vmatmul.msk.f32.gmra.mxu0 %vm647_vm2, %v627_v15 }
 0x162   : > { %v1671_v0 = vpop.f32.mrf.mxu1  ;;  %v1612_v8 = vmax.f32 %v1577_v43, 0.0 }
 0x163   : > { %v1672_v56 = vadd.f32 %v3536_v33, %v1671_v0 }
 0x164   : > { %v3625_v12 = vmul.f32 %v2788_v24, %v1612_v8  ;;  %2236 = vrot.lane.b32.xlu0 %v1612_v8, %s2900_s0  ;;  %v3653_v24 = vpop.permute.xlu0 %2133 }
 0x165   : > { %v1703_v4 = vmax.f32 %v1672_v56, 0.0 }
 0x167   : > { %2691 = vmatmul.msk.f32.gmra.mxu2 %vm1492_vm6, %v1703_v4  ;;  %v1579_v2 = vpop.f32.mrf.mxu3  ;;  %v2792_v11 = vpop.permute.xlu1 %2791 }
 0x168   : > { %v1580_v38 = vadd.f32 %v3562_v29, %v1579_v2  ;;  %v2793_v53 = vunpack.i.l.bf16 %v2792_v11  ;;  %v2794_v3 = vunpack.i.h.bf16 %v2792_v11  ;;  %v2797_v2 = vpop.permute.xlu2 %2796 }
 0x16a   : > { %v1674_v16 = vpop.f32.mrf.mxu1  ;;  %v1613_v28 = vmax.f32 %v1580_v38, 0.0 }
 0x16b   : > { %v1675_v61 = vadd.f32 %v3536_v33, %v1674_v16  ;;  %v628_v16 = vld [vmem:[%s3065_s1 + $0x90] sm:$0xff] }
 0x16c   : > { %v3631_v39 = vmul.f32 %v2789_v18, %v1613_v28  ;;  %2238 = vrot.lane.b32.xlu1 %v1613_v28, %s2900_s0  ;;  %2570 = vmatmul.msk.f32.gmra.mxu0 %vm647_vm2, %v628_v16  ;;  %v2798_v28 = vunpack.i.l.bf16 %v2797_v2 }
 0x16d   : > { %v1704_v40 = vmax.f32 %v1675_v61, 0.0 }
 0x16f   : > { %2692 = vmatmul.msk.f32.gmra.mxu2 %vm1492_vm6, %v1704_v40  ;;  %v1582_v46 = vpop.f32.mrf.mxu3  ;;  %v3664_v11 = vpop.permute.xlu0 %2148 }
 0x170   : > { %v1583_v45 = vadd.f32 %v3562_v29, %v1582_v46  ;;  %v629_v46 = vld [vmem:[%s3065_s1 + $0x98] sm:$0xff] }
 0x172   : > { %v1677_v26 = vpop.f32.mrf.mxu1  ;;  %v1614_v30 = vmax.f32 %v1583_v45, 0.0 }
 0x173   : > { %v1678_v35 = vadd.f32 %v3536_v33, %v1677_v26 }
 0x174   : > { %v3646_v21 = vmul.f32 %v2793_v53, %v1614_v30  ;;  %2240 = vrot.lane.b32.xlu2 %v1614_v30, %s2900_s0  ;;  %2571 = vmatmul.msk.f32.gmra.mxu0 %vm647_vm2, %v629_v46 }
 0x175   : > { %v1705_v31 = vmax.f32 %v1678_v35, 0.0 }
 0x177   : > { %2693 = vmatmul.msk.f32.gmra.mxu2 %vm1492_vm6, %v1705_v31  ;;  %v1585_v62 = vpop.f32.mrf.mxu3  ;;  %v2799_v31 = vunpack.i.h.bf16 %v2797_v2 }
 0x178   : > { %v1586_v56 = vadd.f32 %v3562_v29, %v1585_v62 }
 0x17a   : > { %v1680_v59 = vpop.f32.mrf.mxu1  ;;  %v1615_v4 = vmax.f32 %v1586_v56, 0.0 }
 0x17b   : > { %v1681_v0 = vadd.f32 %v3536_v33, %v1680_v59  ;;  %v3673_v59 = vpop.permute.xlu1 %2153 }
 0x17c   : > { %v3656_v8 = vmul.f32 %v2794_v3, %v1615_v4  ;;  %2242 = vrot.lane.b32.xlu0 %v1615_v4, %s2900_s0  ;;  %v630_v3 = vld [vmem:[%s3065_s1 + $0xa0] sm:$0xff] }
 0x17d   : > { %v1706_v43 = vmax.f32 %v1681_v0, 0.0  ;;  %2572 = vmatmul.msk.f32.gmra.mxu0 %vm647_vm2, %v630_v3 }
 0x17f   : > { %2694 = vmatmul.msk.f32.gmra.mxu2 %vm1492_vm6, %v1706_v43  ;;  %v1588_v18 = vpop.f32.mrf.mxu3 }
 0x180   : > { %v1589_v40 = vadd.f32 %v3562_v29, %v1588_v18 }
 0x182   : > { %v1683_v61 = vpop.f32.mrf.mxu1  ;;  %v1616_v32 = vmax.f32 %v1589_v40, 0.0 }
 0x183   : > { %v1684_v38 = vadd.f32 %v3536_v33, %v1683_v61 }
 0x184   : > { %v3666_v26 = vmul.f32 %v2798_v28, %v1616_v32  ;;  %2244 = vrot.lane.b32.xlu1 %v1616_v32, %s2900_s0  ;;  %v631_v28 = vld [vmem:[%s3065_s1 + $0xa8] sm:$0xff] }
 0x185   : > { %v1707_v25 = vmax.f32 %v1684_v38, 0.0  ;;  %2573 = vmatmul.msk.f32.gmra.mxu0 %vm647_vm2, %v631_v28 }
 0x187   : > { %2695 = vmatmul.msk.f32.gmra.mxu2 %vm1492_vm6, %v1707_v25  ;;  %v1591_v45 = vpop.f32.mrf.mxu3  ;;  %v2802_v56 = vpop.permute.xlu0 %2801 }
 0x188   : > { %v1592_v30 = vadd.f32 %v3562_v29, %v1591_v45  ;;  %v2803_v61 = vunpack.i.l.bf16 %v2802_v56  ;;  %v2804_v45 = vunpack.i.h.bf16 %v2802_v56 }
 0x18a   : > { %v1686_v35 = vpop.f32.mrf.mxu1  ;;  %v1617_v62 = vmax.f32 %v1592_v30, 0.0 }
 0x18b   : > { %v1687_v53 = vadd.f32 %v3536_v33, %v1686_v35 }
 0x18c   : > { %v3676_v0 = vmul.f32 %v2799_v31, %v1617_v62  ;;  %2246 = vrot.lane.b32.xlu2 %v1617_v62, %s2900_s0 }
 0x18d   : > { %v1708_v15 = vmax.f32 %v1687_v53, 0.0 }
 0x18f   : > { %2696 = vmatmul.msk.f32.gmra.mxu2 %vm1492_vm6, %v1708_v15  ;;  %v1594_v4 = vpop.f32.mrf.mxu3  ;;  %v3684_v40 = vpop.permute.xlu1 %2168  ;;  %v632_v15 = vld [vmem:[%s3065_s1 + $0xb0] sm:$0xff] }
 0x190   : > { %v1595_v2 = vadd.f32 %v3562_v29, %v1594_v4  ;;  %2574 = vmatmul.msk.f32.gmra.mxu0 %vm647_vm2, %v632_v15 }
 0x192   : > { %v1689_v43 = vpop.f32.mrf.mxu1  ;;  %v1618_v38 = vmax.f32 %v1595_v2, 0.0  ;;  %v633_v2 = vld [vmem:[%s3065_s1 + $0xb8] sm:$0xff] }
 0x193   : > { %v1690_v16 = vadd.f32 %v3536_v33, %v1689_v43 }
 0x194   : > { %v3687_v25 = vmul.f32 %v2803_v61, %v1618_v38  ;;  %2248 = vrot.lane.b32.xlu0 %v1618_v38, %s2900_s0 }
 0x195   : > { %v1709_v18 = vmax.f32 %v1690_v16, 0.0  ;;  %v3703_v16 = vld [vmem:[%s4120_s13] ss:$0 sm:$0xff] }
 0x197   : > { %2697 = vmatmul.msk.f32.gmra.mxu2 %vm1492_vm6, %v1709_v18  ;;  %v1597_v46 = vpop.f32.mrf.mxu3  ;;  %v2807_v3 = vpop.permute.xlu1 %2806 }
 0x198   : > { %v1598_v53 = vadd.f32 %v3562_v29, %v1597_v46  ;;  %2575 = vmatmul.msk.f32.gmra.mxu0 %vm647_vm2, %v633_v2 }
 0x19a   : > { %v1692_v32 = vpop.f32.mrf.mxu1  ;;  %v1619_v30 = vmax.f32 %v1598_v53, 0.0  ;;  %v634_v53 = vld [vmem:[%s3065_s1 + $0xc0] sm:$0xff] }
 0x19b   : > { %v1693_v35 = vadd.f32 %v3536_v33, %v1692_v32  ;;  %v2808_v33 = vunpack.i.l.bf16 %v2807_v3  ;;  %v2809_v32 = vunpack.i.h.bf16 %v2807_v3 }
 0x19c   : > { %v3695_v62 = vmul.f32 %v2804_v45, %v1619_v30  ;;  %2250 = vrot.lane.b32.xlu1 %v1619_v30, %s2900_s0 }
 0x19d   : > { %v1710_v31 = vmax.f32 %v1693_v35, 0.0 }
 0x19f   : > { %2698 = vmatmul.msk.f32.gmra.mxu2 %vm1492_vm6, %v1710_v31  ;;  %v1600_v43 = vpop.f32.mrf.mxu3  ;;  %vm1854_vm6 = vcmask 261120  }
 0x1a0   : > { %v1601_v4 = vadd.f32 %v3562_v29, %v1600_v43  ;;  %2576 = vmatmul.msk.f32.gmra.mxu0 %vm647_vm2, %v634_v53 }
 0x1a2   : > { %v1620_v56 = vmax.f32 %v1601_v4, 0.0 }
 0x1a4   : > { %v3706_v61 = vmul.f32 %v2808_v33, %v1620_v56  ;;  %2252 = vrot.lane.b32.xlu2 %v1620_v56, %s2900_s0  ;;  %v636_v56 = vld [vmem:[%s3065_s1 + $0xd0] sm:$0xff] }
 0x1a7   : > { %v1603_v38 = vpop.f32.mrf.mxu3 }
 0x1a8   : > { %v1604_v46 = vadd.f32 %v3562_v29, %v1603_v38  ;;  %v635_v29 = vld [vmem:[%s3065_s1 + $0xc8] sm:$0xff] }
 0x1a9   : > { %2577 = vmatmul.msk.f32.gmra.mxu0 %vm647_vm2, %v635_v29 }
 0x1aa   : > { %v1782_v18 = vpop.f32.mrf.mxu2  ;;  %v1621_v45 = vmax.f32 %v1604_v46, 0.0 }
 0x1ab   : > { %v1783_v28 = vadd.f32 %v3703_v16, %v1782_v18 }
 0x1ac   : > { %v3714_v31 = vmul.f32 %v2809_v32, %v1621_v45  ;;  %2254 = vrot.lane.b32.xlu0 %v1621_v45, %s2900_s0  ;;  %v638_v45 = vld [vmem:[%s3065_s1 + $0xe0] sm:$0xff] }
 0x1ad   : > { %v1830_v35 = vmax.f32 %v1783_v28, 0.0  ;;  %v637_v28 = vld [vmem:[%s3065_s1 + $0xd8] sm:$0xff] }
 0x1af   : > { %2699 = vmatmul.msk.f32.vlgmr.msrb.gmra.mxu3 %vm1854_vm6, %v1830_v35 }
 0x1b1   : > { %2578 = vmatmul.msk.f32.gmra.mxu0 %vm647_vm2, %v636_v56 }
 0x1b2   : > { %v1785_v30 = vpop.f32.mrf.mxu2 }
 0x1b3   : > { %v1786_v15 = vadd.f32 %v3703_v16, %v1785_v30 }
 0x1b5   : > { %v1831_v3 = vmax.f32 %v1786_v15, 0.0 }
 0x1b7   : > { %2700 = vmatmul.msk.f32.gmra.mxu3 %vm1854_vm6, %v1831_v3  ;;  %v639_v3 = vld [vmem:[%s3065_s1 + $0xe8] sm:$0xff] }
 0x1b9   : > { %2579 = vmatmul.msk.f32.gmra.mxu0 %vm647_vm2, %v637_v28 }
 0x1ba   : > { %v1788_v43 = vpop.f32.mrf.mxu2 }
 0x1bb   : > { %v1789_v4 = vadd.f32 %v3703_v16, %v1788_v43 }
 0x1bd   : > { %v1832_v33 = vmax.f32 %v1789_v4, 0.0 }
 0x1bf   : > { %2701 = vmatmul.msk.f32.gmra.mxu3 %vm1854_vm6, %v1832_v33  ;;  %v640_v33 = vld [vmem:[%s3065_s1 + $0xf0] sm:$0xff] }
 0x1c1   : > { %2580 = vmatmul.msk.f32.gmra.mxu0 %vm647_vm2, %v638_v45  ;;  %v3748_v45 = vld [vmem:[#allocation2] ss:$0 sm:$0xff] }
 0x1c2   : > { %v1791_v2 = vpop.f32.mrf.mxu2 }
 0x1c3   : > { %v1792_v18 = vadd.f32 %v3703_v16, %v1791_v2 }
 0x1c5   : > { %v1833_v38 = vmax.f32 %v1792_v18, 0.0 }
 0x1c7   : > { %2702 = vmatmul.msk.f32.gmra.mxu3 %vm1854_vm6, %v1833_v38  ;;  %v641_v38 = vld [vmem:[%s3065_s1 + $0xf8] sm:$0xff] }
 0x1c9   : > { %2581 = vmatmul.msk.f32.gmra.mxu0 %vm647_vm2, %v639_v3 }
 0x1ca   : > { %v1794_v32 = vpop.f32.mrf.mxu2 }
 0x1cb   : > { %v1795_v46 = vadd.f32 %v3703_v16, %v1794_v32 }
 0x1cd   : > { %v1834_v35 = vmax.f32 %v1795_v46, 0.0 }
 0x1cf   : > { %2703 = vmatmul.msk.f32.gmra.mxu3 %vm1854_vm6, %v1834_v35 }
 0x1d1   : > { %2582 = vmatmul.msk.f32.gmra.mxu0 %vm647_vm2, %v640_v33  ;;  %v813_v35 = vpop.f32.mrf.mxu0 }
 0x1d2   : > { %v1797_v53 = vpop.f32.mrf.mxu2 }
 0x1d3   : > { %v1798_v30 = vadd.f32 %v3703_v16, %v1797_v53  ;;  %v814_v53 = vadd.f32 %v3748_v45, %v813_v35 }
 0x1d5   : > { %v1835_v15 = vmax.f32 %v1798_v30, 0.0  ;;  %v2817_v30 = vld [vmem:[%s3079_s30 + $0x80] sm:$0xff]  ;;  %v941_v3 = vsub.f32 0.0, %v814_v53 }
 0x1d7   : > { %2704 = vmatmul.msk.f32.gmra.mxu3 %vm1854_vm6, %v1835_v15  ;;  %v909_v15 = vadd.f32 %v2817_v30, %v814_v53 }
 0x1d9   : > { %2583 = vmatmul.msk.f32.gmra.mxu0 %vm647_vm2, %v641_v38  ;;  %v2818_v38 = vld [vmem:[%s3079_s30 + $0x88] sm:$0xff] }
 0x1da   : > { %v1800_v29 = vpop.f32.mrf.mxu2 }
 0x1db   : > { %v1801_v43 = vadd.f32 %v3703_v16, %v1800_v29 }
 0x1dd   : > { %v1836_v4 = vmax.f32 %v1801_v43, 0.0 }
 0x1df   : > { %2705 = vmatmul.msk.f32.gmra.mxu3 %vm1854_vm6, %v1836_v4  ;;  %v1101_v4 = vadd.f32 %v3495_v10, %v941_v3 }
 0x1e1   : > { %vm1133_vm2 = vcmp.ge.f32.partialorder %v909_v15, %v1101_v4 }
 0x1e2   : > { %v1803_v56 = vpop.f32.mrf.mxu2 }
 0x1e3   : > { %v1804_v2 = vadd.f32 %v3703_v16, %v1803_v56  ;;  %v2600_v56 = vsel %vm1133_vm2, 1.0, %v2898_v42 }
 0x1e4   : > { %1230 = vst.msk [vmem:[%s3352_s6 + $0x80] sm:$0xff] %vm1213_vm4, %v2600_v56 }
 0x1e5   : > { %v1837_v18 = vmax.f32 %v1804_v2, 0.0  ;;  %v816_v2 = vpop.f32.mrf.mxu0 }
 0x1e7   : > { %2706 = vmatmul.msk.f32.gmra.mxu3 %vm1854_vm6, %v1837_v18  ;;  %v817_v18 = vadd.f32 %v3748_v45, %v816_v2 }
 0x1ea   : > { %v1806_v28 = vpop.f32.mrf.mxu2 }
 0x1eb   : > { %v1807_v32 = vadd.f32 %v3703_v16, %v1806_v28  ;;  %v910_v28 = vadd.f32 %v2818_v38, %v817_v18 }
 0x1ed   : > { %v1838_v46 = vmax.f32 %v1807_v32, 0.0  ;;  %v942_v32 = vsub.f32 0.0, %v817_v18  ;;  %v819_v15 = vpop.f32.mrf.mxu0 }
 0x1ee   : > { %v820_v3 = vadd.f32 %v3748_v45, %v819_v15 }
 0x1ef   : > { %2707 = vmatmul.msk.f32.gmra.mxu3 %vm1854_vm6, %v1838_v46  ;;  %v1102_v10 = vadd.f32 %v3461_v58, %v942_v32  ;;  %v2820_v32 = vld [vmem:[%s3079_s30 + $0x98] sm:$0xff] }
 0x1f0   : > { %v943_v4 = vsub.f32 0.0, %v820_v3 }
 0x1f1   : > { %vm1134_vm9 = vcmp.ge.f32.partialorder %v910_v28, %v1102_v10 }
 0x1f2   : > { %v1809_v29 = vpop.f32.mrf.mxu2  ;;  %v2601_v30 = vsel %vm1134_vm9, 1.0, %v2898_v42  ;;  %v1103_v58 = vadd.f32 %v3486_v34, %v943_v4 }
 0x1f3   : > { %v1810_v43 = vadd.f32 %v3703_v16, %v1809_v29  ;;  %1231 = vst.msk [vmem:[%s3352_s6 + $0x88] sm:$0xff] %vm1213_vm4, %v2601_v30  ;;  %v2819_v29 = vld [vmem:[%s3079_s30 + $0x90] sm:$0xff] }
 0x1f5   : > { %v1839_v33 = vmax.f32 %v1810_v43, 0.0  ;;  %v911_v43 = vadd.f32 %v2819_v29, %v820_v3  ;;  %v822_v38 = vpop.f32.mrf.mxu0 }
 0x1f6   : > { %v823_v28 = vadd.f32 %v3748_v45, %v822_v38 }
 0x1f7   : > { %2708 = vmatmul.msk.f32.gmra.mxu3 %vm1854_vm6, %v1839_v33  ;;  %vm1135_vm10 = vcmp.ge.f32.partialorder %v911_v43, %v1103_v58  ;;  %v2821_v43 = vld [vmem:[%s3079_s30 + $0xa0] sm:$0xff] }
 0x1f8   : > { %v2602_v18 = vsel %vm1135_vm10, 1.0, %v2898_v42  ;;  %vm2369_vm10 = vcmask 785408  }
 0x1f9   : > { %1232 = vst.msk [vmem:[%s3352_s6 + $0x90] sm:$0xff] %vm1213_vm4, %v2602_v18 }
 0x1fa   : > { %v1812_v46 = vpop.f32.mrf.mxu2 }
 0x1fb   : > { %v1813_v35 = vadd.f32 %v3703_v16, %v1812_v46  ;;  %v912_v46 = vadd.f32 %v2820_v32, %v823_v28 }
 0x1fd   : > { %v1840_v53 = vmax.f32 %v1813_v35, 0.0  ;;  %v944_v35 = vsub.f32 0.0, %v823_v28  ;;  %v825_v3 = vpop.f32.mrf.mxu0 }
 0x1fe   : > { %v826_v29 = vadd.f32 %v3748_v45, %v825_v3 }
 0x1ff   : > { %2709 = vmatmul.msk.f32.gmra.mxu3 %vm1854_vm6, %v1840_v53  ;;  %v1104_v34 = vadd.f32 %v3517_v60, %v944_v35  ;;  %v2822_v35 = vld [vmem:[%s3079_s30 + $0xa8] sm:$0xff] }
 0x200   : > { %v913_v4 = vadd.f32 %v2821_v43, %v826_v29 }
 0x201   : > { %vm1136_vm11 = vcmp.ge.f32.partialorder %v912_v46, %v1104_v34 }
 0x202   : > { %v1815_v33 = vpop.f32.mrf.mxu2  ;;  %v2603_v15 = vsel %vm1136_vm11, 1.0, %v2898_v42 }
 0x203   : > { %v1816_v56 = vadd.f32 %v3703_v16, %v1815_v33  ;;  %1233 = vst.msk [vmem:[%s3352_s6 + $0x98] sm:$0xff] %vm1213_vm4, %v2603_v15  ;;  %v945_v33 = vsub.f32 0.0, %v826_v29 }
 0x205   : > { %v1841_v2 = vmax.f32 %v1816_v56, 0.0  ;;  %v1105_v60 = vadd.f32 %v3475_v23, %v945_v33  ;;  %v828_v38 = vpop.f32.mrf.mxu0 }
 0x206   : > { %v829_v28 = vadd.f32 %v3748_v45, %v828_v38  ;;  %v2824_v38 = vld [vmem:[%s3079_s30 + $0xb8] sm:$0xff] }
 0x207   : > { %2710 = vmatmul.msk.f32.gmra.mxu3 %vm1854_vm6, %v1841_v2  ;;  %vm1137_vm12 = vcmp.ge.f32.partialorder %v913_v4, %v1105_v60  ;;  %v2823_v4 = vld [vmem:[%s3079_s30 + $0xb0] sm:$0xff] }
 0x208   : > { %v2604_v18 = vsel %vm1137_vm12, 1.0, %v2898_v42 }
 0x209   : > { %1234 = vst.msk [vmem:[%s3352_s6 + $0xa0] sm:$0xff] %vm1213_vm4, %v2604_v18 }
 0x20a   : > { %v1818_v10 = vpop.f32.mrf.mxu2 }
 0x20b   : > { %v1819_v53 = vadd.f32 %v3703_v16, %v1818_v10  ;;  %v914_v10 = vadd.f32 %v2822_v35, %v829_v28 }
 0x20d   : > { %v1842_v30 = vmax.f32 %v1819_v53, 0.0  ;;  %v946_v53 = vsub.f32 0.0, %v829_v28 }
 0x20f   : > { %2711 = vmatmul.msk.f32.gmra.mxu3 %vm1854_vm6, %v1842_v30  ;;  %v1106_v34 = vadd.f32 %v3501_v52, %v946_v53  ;;  %v831_v30 = vpop.f32.mrf.mxu0 }
 0x210   : > { %v832_v3 = vadd.f32 %v3748_v45, %v831_v30 }
 0x211   : > { %vm1138_vm13 = vcmp.ge.f32.partialorder %v914_v10, %v1106_v34  ;;  %v2825_v34 = vld [vmem:[%s3079_s30 + $0xc0] sm:$0xff] }
 0x212   : > { %v1821_v56 = vpop.f32.mrf.mxu2  ;;  %v2605_v15 = vsel %vm1138_vm13, 1.0, %v2898_v42  ;;  %v915_v33 = vadd.f32 %v2823_v4, %v832_v3 }
 0x213   : > { %v1822_v58 = vadd.f32 %v3703_v16, %v1821_v56  ;;  %1235 = vst.msk [vmem:[%s3352_s6 + $0xa8] sm:$0xff] %vm1213_vm4, %v2605_v15  ;;  %v947_v56 = vsub.f32 0.0, %v832_v3 }
 0x215   : > { %v1843_v2 = vmax.f32 %v1822_v58, 0.0  ;;  %v1107_v52 = vadd.f32 %v3539_v41, %v947_v56  ;;  %v3812_v41 = vld [vmem:[%s4122_s15] ss:$0 sm:$0xff] }
 0x217   : > { %2712 = vmatmul.msk.f32.gmra.mxu3 %vm1854_vm6, %v1843_v2  ;;  %v834_v60 = vpop.f32.mrf.mxu0  ;;  %vm1139_vm14 = vcmp.ge.f32.partialorder %v915_v33, %v1107_v52 }
 0x218   : > { %v2606_v2 = vsel %vm1139_vm14, 1.0, %v2898_v42  ;;  %v835_v18 = vadd.f32 %v3748_v45, %v834_v60  ;;  %v2826_v60 = vld [vmem:[%s3079_s30 + $0xc8] sm:$0xff] }
 0x219   : > { %1236 = vst.msk [vmem:[%s3352_s6 + $0xb0] sm:$0xff] %vm1213_vm4, %v2606_v2 }
 0x21a   : > { %v1824_v32 = vpop.f32.mrf.mxu2  ;;  %v948_v28 = vsub.f32 0.0, %v835_v18 }
 0x21b   : > { %v1825_v46 = vadd.f32 %v3703_v16, %v1824_v32 }
 0x21c   : > { %v1108_v32 = vadd.f32 %v3489_v37, %v948_v28 }
 0x21d   : > { %v1844_v23 = vmax.f32 %v1825_v46, 0.0 }
 0x21f   : > { %2713 = vmatmul.msk.f32.gmra.mxu3 %vm1854_vm6, %v1844_v23  ;;  %v837_v46 = vpop.f32.mrf.mxu0 }
 0x220   : > { %v838_v10 = vadd.f32 %v3748_v45, %v837_v46 }
 0x222   : > { %v1827_v29 = vpop.f32.mrf.mxu2  ;;  %v917_v30 = vadd.f32 %v2825_v34, %v838_v10  ;;  %v949_v37 = vsub.f32 0.0, %v838_v10 }
 0x223   : > { %v1828_v43 = vadd.f32 %v3703_v16, %v1827_v29  ;;  %v916_v16 = vadd.f32 %v2824_v38, %v835_v18  ;;  %v3821_v29 = vpop.permute.xlu2 %2158 }
 0x224   : > { %v1109_v3 = vadd.f32 %v3521_v1, %v949_v37 }
 0x225   : > { %v1845_v58 = vmax.f32 %v1828_v43, 0.0  ;;  %vm1140_vm15 = vcmp.ge.f32.partialorder %v916_v16, %v1108_v32 }
 0x226   : > { %v2607_v35 = vsel %vm1140_vm15, 1.0, %v2898_v42  ;;  %vm1141_vm0 = vcmp.ge.f32.partialorder %v917_v30, %v1109_v3 }
 0x227   : > { %2714 = vmatmul.msk.f32.gmra.mxu3 %vm1854_vm6, %v1845_v58  ;;  %1237 = vst.msk [vmem:[%s3352_s6 + $0xb8] sm:$0xff] %vm1213_vm4, %v2607_v35  ;;  %v840_v43 = vpop.f32.mrf.mxu0  ;;  %v2608_v33 = vsel %vm1141_vm0, 1.0, %v2898_v42 }
 0x228   : > { %1238 = vst.msk [vmem:[%s3352_s6 + $0xc0] sm:$0xff] %vm1213_vm4, %v2608_v33  ;;  %v841_v58 = vadd.f32 %v3748_v45, %v840_v43 }
 0x22a   : > { %v950_v2 = vsub.f32 0.0, %v841_v58 }
 0x22c   : > { %v1110_v38 = vadd.f32 %v3553_v19, %v950_v2 }
 0x22f   : > { %v843_v16 = vpop.f32.mrf.mxu0 }
 0x230   : > { %v844_v35 = vadd.f32 %v3748_v45, %v843_v16 }
 0x232   : > { %v1920_v53 = vpop.f32.mrf.mxu3 }
 0x233   : > { %v1921_v23 = vadd.f32 %v3812_v41, %v1920_v53  ;;  %v2827_v53 = vld [vmem:[%s3079_s30 + $0xd0] sm:$0xff] }
 0x235   : > { %v1968_v15 = vmax.f32 %v1921_v23, 0.0  ;;  %v951_v23 = vsub.f32 0.0, %v844_v35 }
 0x237   : > { %v2176_v4 = vmul.f32 %v3550_v5, %v1968_v15  ;;  %2288 = vrot.lane.b32.xlu1 %v1968_v15, %s2901_s3  ;;  %v918_v5 = vadd.f32 %v2826_v60, %v841_v58  ;;  %v1111_v30 = vadd.f32 %v3510_v44, %v951_v23  ;;  %v846_v37 = vpop.f32.mrf.mxu0  ;;  %v2828_v44 = vld [vmem:[%s3079_s30 + $0xd8] sm:$0xff] }
 0x238   : > { %v847_v43 = vadd.f32 %v3748_v45, %v846_v37 }
 0x239   : > { %v3827_v56 = vadd.f32 %v2176_v4, %v3574_v55  ;;  %vm1142_vm1 = vcmp.ge.f32.partialorder %v918_v5, %v1110_v38  ;;  %v3837_v55 = vpop.permute.xlu2 %2173 }
 0x23a   : > { %v1923_v1 = vpop.f32.mrf.mxu3  ;;  %v2609_v32 = vsel %vm1142_vm1, 1.0, %v2898_v42 }
 0x23b   : > { %v1924_v52 = vadd.f32 %v3812_v41, %v1923_v1  ;;  %1239 = vst.msk [vmem:[%s3352_s6 + $0xc8] sm:$0xff] %vm1213_vm4, %v2609_v32  ;;  %v920_v1 = vadd.f32 %v2828_v44, %v847_v43 }
 0x23d   : > { %v1969_v18 = vmax.f32 %v1924_v52, 0.0 }
 0x23f   : > { %v2177_v28 = vmul.f32 %v3572_v49, %v1969_v18  ;;  %2290 = vrot.lane.b32.xlu2 %v1969_v18, %s2901_s3  ;;  %v919_v49 = vadd.f32 %v2827_v53, %v844_v35 }
 0x241   : > { %v3841_v46 = vadd.f32 %v2177_v28, %v3582_v36  ;;  %vm1143_vm3 = vcmp.ge.f32.partialorder %v919_v49, %v1111_v30  ;;  %v2229_v4 = vpop.permute.xlu2 %2228 }
 0x242   : > { %v1926_v10 = vpop.f32.mrf.mxu3  ;;  %v2610_v36 = vsel %vm1143_vm3, 1.0, %v2898_v42 }
 0x243   : > { %v1927_v19 = vadd.f32 %v3812_v41, %v1926_v10  ;;  %1240 = vst.msk [vmem:[%s3352_s6 + $0xd0] sm:$0xff] %vm1213_vm4, %v2610_v36 }
 0x245   : > { %v1970_v34 = vmax.f32 %v1927_v19, 0.0 }
 0x247   : > { %v2178_v15 = vmul.f32 %v3588_v9, %v1970_v34  ;;  %2292 = vrot.lane.b32.xlu0 %v1970_v34, %s2901_s3  ;;  %v952_v9 = vsub.f32 0.0, %v847_v43 }
 0x249   : > { %v2194_v3 = vadd.f32 %v2178_v15, %v3590_v13  ;;  %v1112_v5 = vadd.f32 %v3546_v14, %v952_v9  ;;  %v849_v13 = vpop.f32.mrf.mxu0  ;;  %v2829_v14 = vld [vmem:[%s3079_s30 + $0xe0] sm:$0xff] }
 0x24a   : > { %v1929_v33 = vpop.f32.mrf.mxu3  ;;  %v850_v16 = vadd.f32 %v3748_v45, %v849_v13 }
 0x24b   : > { %v1930_v58 = vadd.f32 %v3812_v41, %v1929_v33  ;;  %v3859_v52 = vsel %vm1854_vm6, %v2194_v3, %v2229_v4  ;;  %vm1144_vm5 = vcmp.ge.f32.partialorder %v920_v1, %v1112_v5  ;;  %v2831_v1 = vld [vmem:[%s3079_s30 + $0xf0] sm:$0xff] }
 0x24c   : > { %v2611_v18 = vsel %vm1144_vm5, 1.0, %v2898_v42  ;;  %v921_v35 = vadd.f32 %v2829_v14, %v850_v16 }
 0x24d   : > { %v1971_v60 = vmax.f32 %v1930_v58, 0.0  ;;  %1241 = vst.msk [vmem:[%s3352_s6 + $0xd8] sm:$0xff] %vm1213_vm4, %v2611_v18 }
 0x24f   : > { %v2179_v2 = vmul.f32 %v3595_v20, %v1971_v60  ;;  %2294 = vrot.lane.b32.xlu1 %v1971_v60, %s2901_s3  ;;  %v953_v20 = vsub.f32 0.0, %v850_v16 }
 0x251   : > { %v3866_v38 = vadd.f32 %v2179_v2, %v3598_v22  ;;  %v1113_v19 = vadd.f32 %v3568_v51, %v953_v20  ;;  %v852_v53 = vpop.f32.mrf.mxu0  ;;  %v2830_v51 = vld [vmem:[%s3079_s30 + $0xe8] sm:$0xff] }
 0x252   : > { %v1932_v28 = vpop.f32.mrf.mxu3  ;;  %v853_v34 = vadd.f32 %v3748_v45, %v852_v53 }
 0x253   : > { %v1933_v32 = vadd.f32 %v3812_v41, %v1932_v28  ;;  %vm1145_vm7 = vcmp.ge.f32.partialorder %v921_v35, %v1113_v19  ;;  %v2832_v28 = vld [vmem:[%s3079_s30 + $0xf8] sm:$0xff]  ;;  %v2227_v19 = vpop.permute.xlu1 %2226  ;;  %s582_s30 = sand.u32 1, %s2887_s27  }
 0x254   : > { %v2612_v22 = vsel %vm1145_vm7, 1.0, %v2898_v42  ;;  %v922_v15 = vadd.f32 %v2830_v51, %v853_v34  ;;  %v2164_v51 = vpop.permute.xlu0 %2163  ;;  %s2408_s4 = scalar_lea.sflag [#allocation4], %s582_s30 }
 0x255   : > { %v1972_v10 = vmax.f32 %v1933_v32, 0.0  ;;  %1242 = vst.msk [vmem:[%s3352_s6 + $0xe0] sm:$0xff] %vm1213_vm4, %v2612_v22 }
 0x257   : > { %v2180_v49 = vmul.f32 %v3640_v47, %v1972_v10  ;;  %2296 = vrot.lane.b32.xlu2 %v1972_v10, %s2901_s3  ;;  %v954_v47 = vsub.f32 0.0, %v853_v34  ;;  %v3921_v34 = vpop.permute.xlu2 %2234 }
 0x259   : > { %v3878_v23 = vadd.f32 %v2180_v49, %v3609_v50  ;;  %v1114_v3 = vadd.f32 %v3530_v6, %v954_v47  ;;  %v855_v43 = vpop.f32.mrf.mxu0 }
 0x25a   : > { %v1935_v30 = vpop.f32.mrf.mxu3  ;;  %v856_v58 = vadd.f32 %v3748_v45, %v855_v43 }
 0x25b   : > { %v1936_v37 = vadd.f32 %v3812_v41, %v1935_v30  ;;  %vm1146_vm8 = vcmp.ge.f32.partialorder %v922_v15, %v1114_v3 }
 0x25c   : > { %v2613_v50 = vsel %vm1146_vm8, 1.0, %v2898_v42  ;;  %v923_v9 = vadd.f32 %v2831_v1, %v856_v58 }
 0x25d   : > { %v1973_v36 = vmax.f32 %v1936_v37, 0.0  ;;  %1243 = vst.msk [vmem:[%s3352_s6 + $0xe8] sm:$0xff] %vm1213_vm4, %v2613_v50  ;;  %v2225_v50 = vpop.permute.xlu0 %2224 }
 0x25f   : > { %v2181_v4 = vmul.f32 %v3614_v27, %v1973_v36  ;;  %2298 = vrot.lane.b32.xlu0 %v1973_v36, %s2901_s3  ;;  %v955_v27 = vsub.f32 0.0, %v856_v58  ;;  %v3931_v47 = vpop.permute.xlu2 %2240 }
 0x261   : > { %v3890_v33 = vadd.f32 %v2181_v4, %v3617_v57  ;;  %v1115_v5 = vadd.f32 %v3556_v7, %v955_v27  ;;  %v858_v13 = vpop.f32.mrf.mxu0 }
 0x262   : > { %v1938_v44 = vpop.f32.mrf.mxu3  ;;  %v859_v57 = vadd.f32 %v3748_v45, %v858_v13 }
 0x263   : > { %v1939_v6 = vadd.f32 %v3812_v41, %v1938_v44  ;;  %vm1147_vm2 = vcmp.ge.f32.partialorder %v923_v9, %v1115_v5 }
 0x264   : > { %v2614_v18 = vsel %vm1147_vm2, 1.0, %v2898_v42  ;;  %v924_v32 = vadd.f32 %v2832_v28, %v859_v57  ;;  %v956_v14 = vsub.f32 0.0, %v859_v57  ;;  %v2337_v28 = vsel %vm1854_vm6, %v3841_v46, %v2227_v19 }
 0x265   : > { %v1974_v60 = vmax.f32 %v1939_v6, 0.0  ;;  %1244 = vst.msk [vmem:[%s3352_s6 + $0xf0] sm:$0xff] %vm1213_vm4, %v2614_v18 }
 0x267   : > { %v2182_v2 = vmul.f32 %v3607_v48, %v1974_v60  ;;  %2300 = vrot.lane.b32.xlu1 %v1974_v60, %s2901_s3  ;;  %v1116_v48 = vadd.f32 %v3579_v63, %v956_v14 }
 0x269   : > { %v3903_v16 = vadd.f32 %v2182_v2, %v3625_v12  ;;  %vm1148_vm9 = vcmp.ge.f32.partialorder %v924_v32, %v1116_v48 }
 0x26a   : > { %v1941_v7 = vpop.f32.mrf.mxu3  ;;  %v2615_v10 = vsel %vm1148_vm9, 1.0, %v2898_v42 }
 0x26b   : > { %v1942_v35 = vadd.f32 %v3812_v41, %v1941_v7  ;;  %1245 = vst.msk [vmem:[%s3352_s6 + $0xf8] sm:$0xff] %vm1213_vm4, %v2615_v10  ;;  %s2542_s6 = sshll.u32 %s582_s30, 7  ;;  %vm2352_vm4 = vcmask 523264  }
 0x26c   : > { %s3969_s22 = scalar_lea.vmem [#allocation3], %s2542_s6 }
 0x26d   : > { %v1975_v20 = vmax.f32 %v1942_v35, 0.0  ;;  %s2424_s10 = sshll.u32 %s3969_s22, 4  ;;  %s2425_s10 = int_to_ptr.vmem [resolvable:$true] %s2424_s10 }
 0x26f   : > { %v2183_v45 = vmul.f32 %v3653_v24, %v1975_v20  ;;  %2302 = vrot.lane.b32.xlu2 %v1975_v20, %s2901_s3  ;;  %v3926_v24 = vpop.permute.xlu1 %2232 }
 0x271   : > { %v3916_v12 = vadd.f32 %v2183_v45, %v3631_v39 }
 0x272   : > { %v1944_v53 = vpop.f32.mrf.mxu3 }
 0x273   : > { %v1945_v49 = vadd.f32 %v3812_v41, %v1944_v53 }
 0x275   : > { %v1976_v22 = vmax.f32 %v1945_v49, 0.0 }
 0x277   : > { %v2184_v63 = vmul.f32 %v3623_v17, %v1976_v22  ;;  %2304 = vrot.lane.b32.xlu0 %v1976_v22, %s2901_s3  ;;  %v3936_v36 = vpop.permute.xlu1 %2238 }
 0x279   : > { %v3924_v42 = vadd.f32 %v2184_v63, %v3646_v21 }
 0x27a   : > { %v1947_v30 = vpop.f32.mrf.mxu3 }
 0x27b   : > { %v1948_v39 = vadd.f32 %v3812_v41, %v1947_v30 }
 0x27d   : > { %v1977_v37 = vmax.f32 %v1948_v39, 0.0 }
 0x27f   : > { %v2185_v15 = vmul.f32 %v3644_v54, %v1977_v37  ;;  %2306 = vrot.lane.b32.xlu1 %v1977_v37, %s2901_s3  ;;  %v3941_v54 = vpop.permute.xlu2 %2246  ;;  %v2245_v44 = vpop.permute.xlu1 %2244 }
 0x281   : > { %v3934_v17 = vadd.f32 %v2185_v15, %v3656_v8 }
 0x282   : > { %v1950_v21 = vpop.f32.mrf.mxu3 }
 0x283   : > { %v1951_v3 = vadd.f32 %v3812_v41, %v1950_v21 }
 0x285   : > { %v1978_v43 = vmax.f32 %v1951_v3, 0.0 }
 0x287   : > { %v2186_v4 = vmul.f32 %v3664_v11, %v1978_v43  ;;  %2308 = vrot.lane.b32.xlu2 %v1978_v43, %s2901_s3  ;;  %v2231_v11 = vpop.permute.xlu0 %2230  ;;  %v2253_v60 = vpop.permute.xlu2 %2252  ;;  %v2340_v43 = vsel %vm1854_vm6, %v3878_v23, %v3926_v24 }
 0x288   : > { %v2251_v20 = vpop.permute.xlu1 %2250  ;;  %v2339_v23 = vsel %vm1854_vm6, %v3866_v38, %v2231_v11  ;;  %v2341_v38 = vsel %vm1854_vm6, %v3890_v33, %v3921_v34 }
 0x289   : > { %v2202_v58 = vadd.f32 %v2186_v4, %v3666_v26 }
 0x28a   : > { %v1953_v8 = vpop.f32.mrf.mxu3 }
 0x28b   : > { %v1954_v6 = vadd.f32 %v3812_v41, %v1953_v8  ;;  %v3946_v1 = vsel %vm1854_vm6, %v2202_v58, %v2245_v44 }
 0x28d   : > { %v1979_v9 = vmax.f32 %v1954_v6, 0.0 }
 0x28f   : > { %v2187_v27 = vmul.f32 %v3673_v59, %v1979_v9  ;;  %2310 = vrot.lane.b32.xlu0 %v1979_v9, %s2901_s3  ;;  %v3959_v59 = vpop.permute.xlu0 %2236 }
 0x291   : > { %v3951_v5 = vadd.f32 %v2187_v27, %v3676_v0  ;;  %v2343_v27 = vsel %vm1854_vm6, %v3916_v12, %v3936_v36  ;;  %v2342_v12 = vsel %vm1854_vm6, %v3903_v16, %v3959_v59 }
 0x292   : > { %v1956_v13 = vpop.f32.mrf.mxu3 }
 0x293   : > { %v1957_v26 = vadd.f32 %v3812_v41, %v1956_v13 }
 0x295   : > { %v1980_v2 = vmax.f32 %v1957_v26, 0.0 }
 0x297   : > { %v2188_v57 = vmul.f32 %v3821_v29, %v1980_v2  ;;  %2312 = vrot.lane.b32.xlu1 %v1980_v2, %s2901_s3 }
 0x299   : > { %v3962_v18 = vadd.f32 %v2188_v57, %v3687_v25  ;;  %v2291_v0 = vpop.permute.xlu2 %2290  ;;  %v3973_v25 = vpop.permute.xlu0 %2242 }
 0x29a   : > { %v2354_v32 = vsel %vm2352_vm4, %v2337_v28, %v2291_v0  ;;  %v1959_v14 = vpop.f32.mrf.mxu3 }
 0x29b   : > { %v2371_v7 = vsel %vm2369_vm10, %v2354_v32, 0.0  ;;  %v1960_v29 = vadd.f32 %v3812_v41, %v1959_v14  ;;  %v2344_v32 = vsel %vm1854_vm6, %v3924_v42, %v3931_v47 }
 0x29c   : > { %2387 = vst [vmem:[%s3969_s22 + $0x8] sm:$0xff] %v2371_v7 }
 0x29d   : > { %v1981_v35 = vmax.f32 %v1960_v29, 0.0 }
 0x29f   : > { %v2189_v48 = vmul.f32 %v2164_v51, %v1981_v35  ;;  %2314 = vrot.lane.b32.xlu2 %v1981_v35, %s2901_s3 }
 0x2a1   : > { %v2205_v46 = vadd.f32 %v2189_v48, %v3695_v62  ;;  %v3982_v22 = vpop.permute.xlu0 %2248  ;;  %v2336_v62 = vsel %vm1854_vm6, %v3827_v56, %v2225_v50 }
 0x2a2   : > { %v1962_v10 = vpop.f32.mrf.mxu3 }
 0x2a3   : > { %v1963_v45 = vadd.f32 %v3812_v41, %v1962_v10  ;;  %v3978_v19 = vsel %vm1854_vm6, %v2205_v46, %v2251_v20  ;;  %v2348_v10 = vsel %vm1854_vm6, %v3962_v18, %v3982_v22 }
 0x2a5   : > { %v1982_v53 = vmax.f32 %v1963_v45, 0.0 }
 0x2a7   : > { %v2190_v49 = vmul.f32 %v3684_v40, %v1982_v53  ;;  %2316 = vrot.lane.b32.xlu0 %v1982_v53, %s2901_s3 }
 0x2a9   : > { %v2206_v63 = vadd.f32 %v2190_v49, %v3706_v61  ;;  %v2289_v30 = vpop.permute.xlu1 %2288  ;;  %v2255_v3 = vpop.permute.xlu0 %2254 }
 0x2aa   : > { %v2353_v39 = vsel %vm2352_vm4, %v2336_v62, %v2289_v30  ;;  %v1965_v37 = vpop.f32.mrf.mxu3 }
 0x2ab   : > { %v2370_v51 = vsel %vm2369_vm10, %v2353_v39, 0.0  ;;  %v1966_v15 = vadd.f32 %v3812_v41, %v1965_v37  ;;  %v3991_v40 = vsel %vm1854_vm6, %v2206_v63, %v2253_v60 }
 0x2ac   : > { %2386 = vst [vmem:[%s3969_s22] sm:$0xff] %v2370_v51 }
 0x2ad   : > { %v1983_v21 = vmax.f32 %v1966_v15, 0.0 }
 0x2af   : > { %v2191_v61 = vmul.f32 %v3837_v55, %v1983_v21  ;;  %2318 = vrot.lane.b32.xlu1 %v1983_v21, %s2901_s3  ;;  %s2853_s3 = scalar_lea.hbm %s4124_s17, 256 }
 0x2b0   : > { %p2855_p2 = scmp.lt.s32.totalorder %s2853_s3, %s2849_s25 }
 0x2b1   : > { %v2207_v56 = vadd.f32 %v2191_v61, %v3714_v31  ;;  %v2297_v4 = vpop.permute.xlu2 %2296 }
 0x2b2   : > { %v2357_v41 = vsel %vm2352_vm4, %v2340_v43, %v2297_v4  ;;  %p2856_p3 = por %p2855_p2, %p2854_p1 }
 0x2b3   : > { %v2374_v50 = vsel %vm2369_vm10, %v2357_v41, 0.0  ;;  %v4003_v58 = vsel %vm1854_vm6, %v2207_v56, %v2255_v3 }
 0x2b4   : > { %2390 = vst [vmem:[%s3969_s22 + $0x20] sm:$0xff] %v2374_v50  ;;  %p2857_p4 = pnand %p2856_p3, %p2852_p0 }
 0x2b9   : > { %v2293_v55 = vpop.permute.xlu0 %2292 }
 0x2ba   : > { %v2355_v44 = vsel %vm2352_vm4, %v3859_v52, %v2293_v55 }
 0x2bb   : > { %v2372_v31 = vsel %vm2369_vm10, %v2355_v44, 0.0 }
 0x2bc   : > { %2388 = vst [vmem:[%s3969_s22 + $0x10] sm:$0xff] %v2372_v31 }
 0x2c1   : > { %v2295_v8 = vpop.permute.xlu1 %2294 }
 0x2c2   : > { %v2356_v24 = vsel %vm2352_vm4, %v2339_v23, %v2295_v8 }
 0x2c3   : > { %v2373_v6 = vsel %vm2369_vm10, %v2356_v24, 0.0 }
 0x2c4   : > { %2389 = vst [vmem:[%s3969_s22 + $0x18] sm:$0xff] %v2373_v6 }
 0x2c9   : > { %v2303_v9 = vpop.permute.xlu2 %2302 }
 0x2ca   : > { %v2360_v52 = vsel %vm2352_vm4, %v2343_v27, %v2303_v9 }
 0x2cb   : > { %v2377_v60 = vsel %vm2369_vm10, %v2360_v52, 0.0 }
 0x2cc   : > { %2393 = vst [vmem:[%s3969_s22 + $0x38] sm:$0xff] %v2377_v60 }
 0x2d1   : > { %v2299_v13 = vpop.permute.xlu0 %2298 }
 0x2d2   : > { %v2358_v11 = vsel %vm2352_vm4, %v2341_v38, %v2299_v13 }
 0x2d3   : > { %v2375_v26 = vsel %vm2369_vm10, %v2358_v11, 0.0 }
 0x2d4   : > { %2391 = vst [vmem:[%s3969_s22 + $0x28] sm:$0xff] %v2375_v26 }
 0x2d9   : > { %v2301_v2 = vpop.permute.xlu1 %2300 }
 0x2da   : > { %v2359_v36 = vsel %vm2352_vm4, %v2342_v12, %v2301_v2 }
 0x2db   : > { %v2376_v57 = vsel %vm2369_vm10, %v2359_v36, 0.0 }
 0x2dc   : > { %2392 = vst [vmem:[%s3969_s22 + $0x30] sm:$0xff] %v2376_v57 }
 0x2e1   : > { %v2309_v0 = vpop.permute.xlu2 %2308 }
 0x2e2   : > { %v2363_v33 = vsel %vm2352_vm4, %v3946_v1, %v2309_v0  ;;  %v2345_v1 = vsel %vm1854_vm6, %v3934_v17, %v3973_v25  ;;  %v2347_v17 = vsel %vm1854_vm6, %v3951_v5, %v3941_v54 }
 0x2e3   : > { %v2380_v34 = vsel %vm2369_vm10, %v2363_v33, 0.0 }
 0x2e4   : > { %2396 = vst [vmem:[%s3969_s22 + $0x50] sm:$0xff] %v2380_v34 }
 0x2e9   : > { %v2305_v28 = vpop.permute.xlu0 %2304 }
 0x2ea   : > { %v2361_v16 = vsel %vm2352_vm4, %v2344_v32, %v2305_v28 }
 0x2eb   : > { %v2378_v59 = vsel %vm2369_vm10, %v2361_v16, 0.0 }
 0x2ec   : > { %2394 = vst [vmem:[%s3969_s22 + $0x40] sm:$0xff] %v2378_v59 }
 0x2f1   : > { %v2307_v14 = vpop.permute.xlu1 %2306 }
 0x2f2   : > { %v2362_v7 = vsel %vm2352_vm4, %v2345_v1, %v2307_v14 }
 0x2f3   : > { %v2379_v29 = vsel %vm2369_vm10, %v2362_v7, 0.0 }
 0x2f4   : > { %2395 = vst [vmem:[%s3969_s22 + $0x48] sm:$0xff] %v2379_v29 }
 0x2f9   : > { %v2315_v35 = vpop.permute.xlu2 %2314 }
 0x2fa   : > { %v2366_v42 = vsel %vm2352_vm4, %v3978_v19, %v2315_v35 }
 0x2fb   : > { %v2383_v47 = vsel %vm2369_vm10, %v2366_v42, 0.0 }
 0x2fc   : > { %2399 = vst [vmem:[%s3969_s22 + $0x68] sm:$0xff] %v2383_v47 }
 0x301   : > { %v2311_v48 = vpop.permute.xlu0 %2310 }
 0x302   : > { %v2364_v25 = vsel %vm2352_vm4, %v2347_v17, %v2311_v48 }
 0x303   : > { %v2381_v20 = vsel %vm2369_vm10, %v2364_v25, 0.0 }
 0x304   : > { %2397 = vst [vmem:[%s3969_s22 + $0x58] sm:$0xff] %v2381_v20 }
 0x309   : > { %v2313_v46 = vpop.permute.xlu1 %2312 }
 0x30a   : > { %v2365_v45 = vsel %vm2352_vm4, %v2348_v10, %v2313_v46 }
 0x30b   : > { %v2382_v19 = vsel %vm2369_vm10, %v2365_v45, 0.0 }
 0x30c   : > { %2398 = vst [vmem:[%s3969_s22 + $0x60] sm:$0xff] %v2382_v19 }
 0x319   : > { %v2317_v53 = vpop.permute.xlu0 %2316 }
 0x31a   : > { %v2367_v54 = vsel %vm2352_vm4, %v3991_v40, %v2317_v53 }
 0x31b   : > { %v2384_v5 = vsel %vm2369_vm10, %v2367_v54, 0.0 }
 0x31c   : > { %2400 = vst [vmem:[%s3969_s22 + $0x70] sm:$0xff] %v2384_v5 }
 0x321   : > { %v2319_v18 = vpop.permute.xlu1 %2318 }
 0x322   : > { %v2368_v49 = vsel %vm2352_vm4, %v4003_v58, %v2319_v18 }
 0x323   : > { %v2385_v22 = vsel %vm2369_vm10, %v2368_v49, 0.0 }
 0x324   : > { %2401 = vst [vmem:[%s3969_s22 + $0x78] sm:$0xff] %v2385_v22 }
 0x325   : > { %2860 = shalt.err (!%p2857_p4)
}
 0x326   : > { %s2902_s30 = smov 128   ;;  %s2903_s22 = smov 8  }
 0x327   : > { %2721 = dma.vmem_to_hbm [thread:$0]  (%p3035_p5), %s2425_s10, 2048, %s2427_s28, %s2408_s4, %s2902_s30, %s2902_s30, %s2903_s22  }
 0x328 PF: > { %p2727_p7 = scmp.ge.s32.totalorder %s2895_s29, 2  ;;  %s2449_s0 = sand.u32 1, %s2883_s26  }
 0x329   : > { %s2450_s24 = scalar_lea.sflag [#allocation4], %s2449_s0 }
 0x32a   : > { %p2724_p8 = pnand %p2727_p7, %p3039_p6 }
 0x32c   : > { %p2725_p9 = pneg %p2724_p8 }
 0x32e   : > { %2878 = dma.done.wait (%p2725_p9), %s2450_s24, 2048  }
 0x32f   : > { %2880 = vsyncadd (%p2725_p9), %s2450_s24, 4294965248  ;;  %s4145_s29 = sld [smem:[#allocation7_spill]]  ;;  %s4148_s26 = smov %s2887_s27 }
 0x330   : > { %s4146_s5 = sld [smem:[#allocation6_spill]] }
 0x331   : > { %s4147_s28 = sld [smem:[#allocation8_spill]] }
 0x335   : > { %p30_p10 = scmp.ge.s32.totalorder %s4145_s29, 4  }
 0x336   : > { %s4149_s27 = smov %s4146_s5 }
 0x337   :  { %32 = sbr.rel (!%p30_p10) target bundleno = 10 (0xa), region = 137 }
 0x33c   :  { %2456 = vsyncpa [#allocation4], 1 }
 0x33d   :  { %2458 = vsyncpa [#allocation4 + $0x1], 1 }

</bundles_post_ra>
